<compile_context>
chip_gen: v5e
topology: v5e:2x2
jax: 0.10.0
libtpu: 0.0.40
codegen_flags: <defaults>
</compile_context>

<pallas_src>
import functools

import jax
import jax.numpy as jnp
from jax.experimental import pallas as pl
from jax.experimental.pallas import tpu as pltpu

LANES = 128          # vreg lane width; last dim of the flattened slab
STRIP = 256          # rows per in-kernel strip (32 f32 vregs per input)
MAX_SPB = 8          # max strips per grid block -> tm <= 2048 rows
PAD_LOGIT = -100.0   # padding logit: with target 0 the padded loss is exactly 0 (no mask)


def _bce_blur_kernel(pred_ref, true_ref, out_ref, *, inv_alpha, strips):
    """One grid block: (strips*STRIP, 128) elements -> (8, 128) lane-wise partial sums."""
    acc = jnp.zeros((8, LANES), jnp.float32)
    # Static Python loop (strips <= 8): intermediates stay at (STRIP, 128) so the
    # elementwise chain stays close to vreg-resident instead of materializing a full
    # (tm, 128) loss tile in VMEM.
    for s in range(strips):
        x = pred_ref[pl.ds(s * STRIP, STRIP), :].astype(jnp.float32)
        y = true_ref[pl.ds(s * STRIP, STRIP), :].astype(jnp.float32)

        # BCEWithLogitsLoss(reduction='none'):
        #   loss = max(x, 0) - x*y + log(1 + exp(-|x|))
        e = jnp.exp(-jnp.abs(x))            # shared exp (also feeds sigmoid)
        d = 1.0 + e
        bce = jnp.maximum(x, 0.0) - x * y + jnp.log(d)

        # sigmoid(x) from e:  x >= 0 -> 1/(1+e),  x < 0 -> e/(1+e) == 1 - 1/(1+e)
        r = pl.reciprocal(d, approx=True)   # EUP vrcp in a slack slot
        r = r * (2.0 - d * r)               # one Newton step (keeps f32-level accuracy)
        p = jnp.where(x >= 0.0, r, 1.0 - r)

        # alpha factor; divide strength-reduced to a multiply by a Python constant
        af = 1.0 - jnp.exp((p - y - 1.0) * inv_alpha)
        loss = bce * af

        # (STRIP, 128) -> (8, 128) lane-wise partial sums: pure vreg adds (VPU),
        # no cross-lane reduction in the hot loop.
        acc = acc + loss.reshape(STRIP // 8, 8, LANES).sum(axis=0)

    out_ref[...] = acc


def bce_blur_with_logits_loss(pred, true, alpha=0.05):
    """Mean of BCEWithLogits(pred, true) * (1 - exp((sigmoid(pred) - true - 1)/(alpha + 1e-4)))."""
    assert pred.shape == true.shape
    total = int(pred.size)
    inv_alpha = 1.0 / (float(alpha) + 0.0001)       # precomputed: mul instead of divide

    rows = -(-total // LANES)                       # ceil(total / 128)
    strips_total = max(1, -(-rows // STRIP))        # total 256-row strips
    if strips_total <= 2 * MAX_SPB:
        spb = max(1, -(-strips_total // 2))         # >= 2 blocks when possible (v7x: 2 TCs)
    else:
        spb = MAX_SPB
    tm = spb * STRIP                                # rows per grid block
    n_blocks = -(-strips_total // spb)
    padded_rows = n_blocks * tm
    padded_total = padded_rows * LANES

    pf = jnp.ravel(pred)    # keep producer dtype (bf16 halves HBM bytes); kernel upcasts
    tf = jnp.ravel(true)
    if padded_total != total:
        # logit -100 / target 0 -> padded per-element loss is exactly 0, no mask needed.
        pf = jnp.pad(pf, (0, padded_total - total), constant_values=PAD_LOGIT)
        tf = jnp.pad(tf, (0, padded_total - total), constant_values=0.0)
    pf = pf.reshape(padded_rows, LANES)
    tf = tf.reshape(padded_rows, LANES)

    kernel = functools.partial(_bce_blur_kernel, inv_alpha=inv_alpha, strips=spb)

    partials = pl.pallas_call(
        kernel,
        out_shape=jax.ShapeDtypeStruct((n_blocks * 8, LANES), jnp.float32),
        grid_spec=pltpu.PrefetchScalarGridSpec(
            num_scalar_prefetch=0,
            grid=(n_blocks,),
            in_specs=[
                pl.BlockSpec((tm, LANES), lambda i: (i, 0)),
                pl.BlockSpec((tm, LANES), lambda i: (i, 0)),
            ],
            out_specs=pl.BlockSpec((8, LANES), lambda i: (i, 0)),
        ),
        compiler_params=pltpu.CompilerParams(
            dimension_semantics=("parallel",),
        ),
        cost_estimate=pl.CostEstimate(
            flops=14 * padded_total,
            transcendentals=3 * padded_total,
            bytes_accessed=(pred.dtype.itemsize + true.dtype.itemsize) * padded_total
            + 4 * n_blocks * 8 * LANES,
        ),
    )(pf, tf)

    # Tiny final reduction (n_blocks*8 x 128 f32) + mean, done outside the kernel.
    return jnp.sum(partials) / jnp.float32(total)


def _reference(pred, true, alpha=0.05):
    x = pred.astype(jnp.float32)
    y = true.astype(jnp.float32)
    loss = jnp.maximum(x, 0.0) - x * y + jnp.log1p(jnp.exp(-jnp.abs(x)))
    p = jax.nn.sigmoid(x)
    dx = p - y
    loss = loss * (1.0 - jnp.exp((dx - 1.0) / (alpha + 0.0001)))
    return jnp.mean(loss)


if __name__ == "__main__":
    key = jax.random.PRNGKey(0)
    k1, k2, k3, k4 = jax.random.split(key, 4)

    loss_fn = jax.jit(functools.partial(bce_blur_with_logits_loss, alpha=0.05))

    # Primary small case: NCHW logits and {0,1} targets, as in YOLOv5 obj/cls loss.
    pred = jax.random.normal(k1, (2, 4, 16, 16), dtype=jnp.float32)
    true = (jax.random.uniform(k2, (2, 4, 16, 16)) > 0.5).astype(jnp.float32)
    out = jax.block_until_ready(loss_fn(pred, true))
    ref = _reference(pred, true, alpha=0.05)
    assert jnp.allclose(out, ref, rtol=1e-4, atol=1e-6), (out, ref)

    # Second case: exercises the multi-block "parallel" grid + -100-padded tail.
    pred2 = jax.random.normal(k3, (4, 16, 63, 64), dtype=jnp.float32)
    true2 = (jax.random.uniform(k4, (4, 16, 63, 64)) > 0.5).astype(jnp.float32)
    out2 = jax.block_until_ready(loss_fn(pred2, true2))
    ref2 = _reference(pred2, true2, alpha=0.05)
    assert jnp.allclose(out2, ref2, rtol=1e-4, atol=1e-6), (out2, ref2)

    print("KERNEL_OK")
</pallas_src>

<mosaic_0001>
module attributes {stable_mosaic.version = 11 : i64} {
  func.func @_bce_blur_kernel(%arg0: i32, %arg1: memref<256x128xf32, #tpu.memory_space<vmem>>, %arg2: memref<256x128xf32, #tpu.memory_space<vmem>>, %arg3: memref<8x128xf32, #tpu.memory_space<vmem>>) attributes {dimension_semantics = [#tpu.dimension_semantics<parallel>], iteration_bounds = array<i64: 1>, scalar_prefetch = 0 : i64, scratch_operands = 0 : i64, tpu.core_type = #tpu.core_type<tc>, window_params = [{transform_indices = @transform_0, window_bounds = array<i64: 256, 128>}, {transform_indices = @transform_1, window_bounds = array<i64: 256, 128>}, {transform_indices = @transform_2, window_bounds = array<i64: 8, 128>}]} {
    %cst = arith.constant 0.000000e+00 : f32
    %0 = vector.broadcast %cst : f32 to vector<8x128xf32>
    %c0 = arith.constant 0 : index
    %c0_0 = arith.constant 0 : index
    %1 = vector.load %arg1[%c0, %c0_0] : memref<256x128xf32, #tpu.memory_space<vmem>>, vector<256x128xf32>
    %c0_1 = arith.constant 0 : index
    %c0_2 = arith.constant 0 : index
    %2 = vector.load %arg2[%c0_1, %c0_2] : memref<256x128xf32, #tpu.memory_space<vmem>>, vector<256x128xf32>
    %3 = math.absf %1 : vector<256x128xf32>
    %cst_3 = arith.constant 0.000000e+00 : f32
    %4 = vector.broadcast %cst_3 : f32 to vector<256x128xf32>
    %5 = arith.subf %4, %3 : vector<256x128xf32>
    %6 = math.exp %5 : vector<256x128xf32>
    %cst_4 = arith.constant 1.000000e+00 : f32
    %7 = vector.broadcast %cst_4 : f32 to vector<256x128xf32>
    %8 = arith.addf %7, %6 : vector<256x128xf32>
    %cst_5 = arith.constant 0.000000e+00 : f32
    %9 = vector.broadcast %cst_5 : f32 to vector<256x128xf32>
    %10 = arith.maximumf %1, %9 : vector<256x128xf32>
    %11 = arith.mulf %1, %2 : vector<256x128xf32>
    %12 = arith.subf %10, %11 : vector<256x128xf32>
    %13 = math.log %8 : vector<256x128xf32>
    %14 = arith.addf %12, %13 : vector<256x128xf32>
    %15 = tpu.reciprocal %8 {approx = true} : vector<256x128xf32> -> vector<256x128xf32>
    %16 = arith.mulf %8, %15 : vector<256x128xf32>
    %cst_6 = arith.constant 2.000000e+00 : f32
    %17 = vector.broadcast %cst_6 : f32 to vector<256x128xf32>
    %18 = arith.subf %17, %16 : vector<256x128xf32>
    %19 = arith.mulf %15, %18 : vector<256x128xf32>
    %cst_7 = arith.constant 0.000000e+00 : f32
    %20 = vector.broadcast %cst_7 : f32 to vector<256x128xf32>
    %21 = arith.cmpf oge, %1, %20 : vector<256x128xf32>
    %cst_8 = arith.constant 1.000000e+00 : f32
    %22 = vector.broadcast %cst_8 : f32 to vector<256x128xf32>
    %23 = arith.subf %22, %19 : vector<256x128xf32>
    %24 = arith.select %21, %19, %23 : vector<256x128xi1>, vector<256x128xf32>
    %25 = arith.subf %24, %2 : vector<256x128xf32>
    %cst_9 = arith.constant 1.000000e+00 : f32
    %26 = vector.broadcast %cst_9 : f32 to vector<256x128xf32>
    %27 = arith.subf %25, %26 : vector<256x128xf32>
    %cst_10 = arith.constant 19.9600792 : f32
    %28 = vector.broadcast %cst_10 : f32 to vector<256x128xf32>
    %29 = arith.mulf %27, %28 : vector<256x128xf32>
    %30 = math.exp %29 : vector<256x128xf32>
    %cst_11 = arith.constant 1.000000e+00 : f32
    %31 = vector.broadcast %cst_11 : f32 to vector<256x128xf32>
    %32 = arith.subf %31, %30 : vector<256x128xf32>
    %33 = arith.mulf %14, %32 : vector<256x128xf32>
    %34 = vector.shape_cast %33 : vector<256x128xf32> to vector<32x8x128xf32>
    %cst_12 = arith.constant dense<0.000000e+00> : vector<8x128xf32>
    %35 = vector.multi_reduction <add>, %34, %cst_12 [0] : vector<32x8x128xf32> to vector<8x128xf32>
    %36 = arith.addf %0, %35 : vector<8x128xf32>
    %c0_13 = arith.constant 0 : index
    %c0_14 = arith.constant 0 : index
    %37 = vector.load %arg3[%c0_13, %c0_14] : memref<8x128xf32, #tpu.memory_space<vmem>>, vector<8x128xf32>
    tpu.vector_store %arg3[%c0_13, %c0_14], %36 {strides = array<i32>} : memref<8x128xf32, #tpu.memory_space<vmem>>, vector<8x128xf32>,
    return
  }
  func.func @transform_0(%arg0: i32) -> (i32, i32) {
    %c0_i32 = arith.constant 0 : i32
    %c0_i32_0 = arith.constant 0 : i32
    return %arg0, %c0_i32 : i32, i32
  }
  func.func @transform_1(%arg0: i32) -> (i32, i32) {
    %c0_i32 = arith.constant 0 : i32
    %c0_i32_0 = arith.constant 0 : i32
    return %arg0, %c0_i32 : i32, i32
  }
  func.func @transform_2(%arg0: i32) -> (i32, i32) {
    %c0_i32 = arith.constant 0 : i32
    %c0_i32_0 = arith.constant 0 : i32
    return %arg0, %c0_i32 : i32, i32
  }
}

</mosaic_0001>

<bundles_post_ra>
// kernel: bce_blur_with_logits_loss.1
= control target key start
LH: loop header
LB: loop body
LE: loop exit
PB: predicated region body
PF: predicated region fallthrough
CT: control target
= control target key end

     0   :  { %s2951_s0 = inlined_call_operand.vmem [shape: f32[256,128], index: 0, kind: input, shape index: {}]   ;;  %s2952_s1 = inlined_call_operand.vmem [shape: f32[256,128], index: 1, kind: input, shape index: {}]   ;;  %s2953_s2 = inlined_call_operand.vmem [shape: f32[8,128], index: 2, kind: output, shape index: {}]  }
   0x1   :  { %v1254_v0 = vld [vmem:[%s2951_s0] sm:$0xff]  ;;  %v1259_v1 = vld [vmem:[%s2951_s0 + $0x8] sm:$0xff]  ;;  %v1264_v2 = vld [vmem:[%s2951_s0 + $0x10] sm:$0xff] }
   0x2   :  { %v1269_v3 = vld [vmem:[%s2951_s0 + $0x18] sm:$0xff]  ;;  %v75_v4 = vand.u32 2147483647, %v1254_v0  ;;  %v1275_v5 = vld [vmem:[%s2951_s0 + $0x20] sm:$0xff]  ;;  %v76_v6 = vand.u32 2147483647, %v1259_v1 }
   0x3   :  { %v1281_v7 = vld [vmem:[%s2951_s0 + $0x28] sm:$0xff]  ;;  %v77_v8 = vand.u32 2147483647, %v1264_v2  ;;  %v1287_v9 = vld [vmem:[%s2951_s0 + $0x30] sm:$0xff]  ;;  %v78_v10 = vand.u32 2147483647, %v1269_v3 }
   0x4   :  { %v1293_v11 = vld [vmem:[%s2951_s0 + $0x38] sm:$0xff]  ;;  %v79_v12 = vand.u32 2147483647, %v1275_v5  ;;  %v107_v13 = vsub.f32 0.0, %v75_v4  ;;  %v1299_v14 = vld [vmem:[%s2951_s0 + $0x40] sm:$0xff]  ;;  %v108_v16 = vsub.f32 0.0, %v76_v6 }
   0x5   :  { %v80_v15 = vand.u32 2147483647, %v1281_v7  ;;  %v1305_v17 = vld [vmem:[%s2951_s0 + $0x48] sm:$0xff]  ;;  %v81_v18 = vand.u32 2147483647, %v1287_v9  ;;  %v109_v19 = vsub.f32 0.0, %v77_v8 }
   0x6   :  { %v1311_v20 = vld [vmem:[%s2951_s0 + $0x50] sm:$0xff]  ;;  %v82_v21 = vand.u32 2147483647, %v1293_v11  ;;  %v110_v22 = vsub.f32 0.0, %v78_v10  ;;  %v1317_v23 = vld [vmem:[%s2951_s0 + $0x58] sm:$0xff]  ;;  %v111_v25 = vsub.f32 0.0, %v79_v12 }
   0x7   :  { %3067 = vst [vmem:[#allocation2_spill] sm:$0xff] %v1317_v23  ;;  %v83_v24 = vand.u32 2147483647, %v1299_v14  ;;  %v139_v26 = vmul.f32 1.442695, %v107_v13  ;;  %v1323_v27 = vld [vmem:[%s2951_s0 + $0x60] sm:$0xff] }
   0x8   :  { %v84_v28 = vand.u32 2147483647, %v1305_v17  ;;  %v112_v29 = vsub.f32 0.0, %v80_v15  ;;  %v141_v30 = vmul.f32 1.442695, %v108_v16  ;;  %v1329_v31 = vld [vmem:[%s2951_s0 + $0x68] sm:$0xff] }
   0x9   :  { %3068 = vst [vmem:[#allocation3_spill] sm:$0xff] %v1329_v31  ;;  %v85_v32 = vand.u32 2147483647, %v1311_v20  ;;  %v113_v33 = vsub.f32 0.0, %v81_v18  ;;  %v143_v34 = vmul.f32 1.442695, %v109_v19  ;;  %944 = vpow2.f32 %v139_v26 }
   0xa   :  { %v1335_v35 = vld [vmem:[%s2951_s0 + $0x70] sm:$0xff]  ;;  %v86_v36 = vand.u32 2147483647, %v1317_v23  ;;  %v114_v37 = vsub.f32 0.0, %v82_v21  ;;  %v145_v38 = vmul.f32 1.442695, %v110_v22  ;;  %946 = vpow2.f32 %v141_v30 }
   0xb   :  { %v1341_v39 = vld [vmem:[%s2951_s0 + $0x78] sm:$0xff]  ;;  %v87_v40 = vand.u32 2147483647, %v1323_v27  ;;  %v115_v41 = vsub.f32 0.0, %v83_v24  ;;  %v147_v42 = vmul.f32 1.442695, %v111_v25  ;;  %948 = vpow2.f32 %v143_v34 }
   0xc   :  { %3069 = vst [vmem:[#allocation4_spill] sm:$0xff] %v1341_v39  ;;  %v1347_v43 = vld [vmem:[%s2951_s0 + $0x80] sm:$0xff]  ;;  %v88_v44 = vand.u32 2147483647, %v1329_v31  ;;  %v116_v45 = vsub.f32 0.0, %v84_v28  ;;  %v1353_v47 = vld [vmem:[%s2951_s0 + $0x88] sm:$0xff]  ;;  %950 = vpow2.f32 %v145_v38 }
   0xd   :  { %v149_v46 = vmul.f32 1.442695, %v112_v29  ;;  %3070 = vst [vmem:[#allocation5_spill] sm:$0xff] %v1353_v47  ;;  %v89_v48 = vand.u32 2147483647, %v1335_v35  ;;  %v117_v49 = vsub.f32 0.0, %v85_v32  ;;  %952 = vpow2.f32 %v147_v42 }
   0xe   :  { %v151_v50 = vmul.f32 1.442695, %v113_v33  ;;  %v1359_v51 = vld [vmem:[%s2951_s0 + $0x90] sm:$0xff]  ;;  %v90_v52 = vand.u32 2147483647, %v1341_v39  ;;  %v118_v53 = vsub.f32 0.0, %v86_v36 }
   0xf   :  { %v153_v54 = vmul.f32 1.442695, %v114_v37  ;;  %v1365_v55 = vld [vmem:[%s2951_s0 + $0x98] sm:$0xff]  ;;  %v91_v56 = vand.u32 2147483647, %v1347_v43  ;;  %v119_v57 = vsub.f32 0.0, %v87_v40  ;;  %954 = vpow2.f32 %v149_v46  ;;  %v1374_v63 = vpop.eup %944 }
  0x10   :  { %v155_v58 = vmul.f32 1.442695, %v115_v41  ;;  %v1371_v59 = vld [vmem:[%s2951_s0 + $0xa0] sm:$0xff]  ;;  %v92_v60 = vand.u32 2147483647, %v1353_v47  ;;  %v120_v61 = vsub.f32 0.0, %v88_v44  ;;  %956 = vpow2.f32 %v151_v50  ;;  %v1382_v12 = vpop.eup %946 }
  0x11   :  { %3071 = vst [vmem:[#allocation6_spill] sm:$0xff] %v1371_v59  ;;  %v157_v62 = vmul.f32 1.442695, %v116_v45  ;;  %v1379_v4 = vld [vmem:[%s2951_s0 + $0xa8] sm:$0xff]  ;;  %v93_v6 = vand.u32 2147483647, %v1359_v51  ;;  %958 = vpow2.f32 %v153_v54  ;;  %v1390_v19 = vpop.eup %948 }
  0x12   :  { %v121_v8 = vsub.f32 0.0, %v89_v48  ;;  %v159_v10 = vmul.f32 1.442695, %v117_v49  ;;  %v1387_v13 = vld [vmem:[%s2951_s0 + $0xb0] sm:$0xff]  ;;  %v94_v15 = vand.u32 2147483647, %v1365_v55  ;;  %960 = vpow2.f32 %v155_v58  ;;  %v1398_v26 = vpop.eup %950 }
  0x13   :  { %3072 = vst [vmem:[#allocation7_spill] sm:$0xff] %v1387_v13  ;;  %v122_v16 = vsub.f32 0.0, %v90_v52  ;;  %v161_v18 = vmul.f32 1.442695, %v118_v53  ;;  %v1395_v21 = vld [vmem:[%s2951_s0 + $0xb8] sm:$0xff]  ;;  %v123_v24 = vsub.f32 0.0, %v91_v56  ;;  %962 = vpow2.f32 %v157_v62  ;;  %v1406_v33 = vpop.eup %952 }
  0x14   :  { %3073 = vst [vmem:[#allocation8_spill] sm:$0xff] %v1395_v21  ;;  %v95_v22 = vand.u32 2147483647, %v1371_v59  ;;  %v163_v25 = vmul.f32 1.442695, %v119_v57  ;;  %v1403_v28 = vld [vmem:[%s2951_s0 + $0xc0] sm:$0xff]  ;;  %964 = vpow2.f32 %v159_v10 }
  0x15   :  { %3074 = vst [vmem:[#allocation9_spill] sm:$0xff] %v1403_v28  ;;  %v96_v29 = vand.u32 2147483647, %v1379_v4  ;;  %v124_v30 = vsub.f32 0.0, %v92_v60  ;;  %v165_v32 = vmul.f32 1.442695, %v120_v61  ;;  %v1414_v40 = vpop.eup %954  ;;  %966 = vpow2.f32 %v161_v18 }
  0x16   :  { %v1411_v34 = vld [vmem:[%s2951_s0 + $0xc8] sm:$0xff]  ;;  %v97_v36 = vand.u32 2147483647, %v1387_v13  ;;  %v125_v37 = vsub.f32 0.0, %v93_v6  ;;  %v167_v38 = vmul.f32 1.442695, %v121_v8  ;;  %v1422_v46 = vpop.eup %956  ;;  %968 = vpow2.f32 %v163_v25 }
  0x17   :  { %3075 = vst [vmem:[#allocation10_spill] sm:$0xff] %v1411_v34  ;;  %v1419_v41 = vld [vmem:[%s2951_s0 + $0xd0] sm:$0xff]  ;;  %v98_v42 = vand.u32 2147483647, %v1395_v21  ;;  %v126_v44 = vsub.f32 0.0, %v94_v15  ;;  %v1427_v48 = vld [vmem:[%s2951_s0 + $0xd8] sm:$0xff]  ;;  %v1430_v53 = vpop.eup %958  ;;  %970 = vpow2.f32 %v165_v32 }
  0x18   :  { %3076 = vst [vmem:[#allocation11_spill] sm:$0xff] %v1419_v41  ;;  %v169_v45 = vmul.f32 1.442695, %v122_v16  ;;  %v99_v49 = vand.u32 2147483647, %v1403_v28  ;;  %v127_v50 = vsub.f32 0.0, %v95_v22  ;;  %v1438_v60 = vpop.eup %960  ;;  %972 = vpow2.f32 %v167_v38 }
  0x19   :  { %3077 = vst [vmem:[#allocation12_spill] sm:$0xff] %v1427_v48  ;;  %v171_v52 = vmul.f32 1.442695, %v123_v24  ;;  %v1435_v54 = vld [vmem:[%s2951_s0 + $0xe0] sm:$0xff]  ;;  %v100_v56 = vand.u32 2147483647, %v1411_v34  ;;  %v1446_v10 = vpop.eup %962 }
  0x1a   :  { %3078 = vst [vmem:[#allocation13_spill] sm:$0xff] %v1435_v54  ;;  %v128_v57 = vsub.f32 0.0, %v96_v29  ;;  %v173_v58 = vmul.f32 1.442695, %v124_v30  ;;  %v1443_v61 = vld [vmem:[%s2951_s0 + $0xe8] sm:$0xff]  ;;  %v129_v6 = vsub.f32 0.0, %v97_v36  ;;  %974 = vpow2.f32 %v169_v45  ;;  %v1454_v24 = vpop.eup %964 }
  0x1b   :  { %3079 = vst [vmem:[#allocation14_spill] sm:$0xff] %v1443_v61  ;;  %v101_v62 = vand.u32 2147483647, %v1419_v41  ;;  %v175_v8 = vmul.f32 1.442695, %v125_v37  ;;  %v1451_v15 = vld [vmem:[%s2951_s0 + $0xf0] sm:$0xff]  ;;  %976 = vpow2.f32 %v171_v52  ;;  %v1462_v36 = vpop.eup %966 }
  0x1c   :  { %3080 = vst [vmem:[#allocation15_spill] sm:$0xff] %v1451_v15  ;;  %v102_v16 = vand.u32 2147483647, %v1427_v48  ;;  %v130_v18 = vsub.f32 0.0, %v98_v42  ;;  %v177_v22 = vmul.f32 1.442695, %v126_v44  ;;  %978 = vpow2.f32 %v173_v58  ;;  %v1465_v44 = vpop.eup %968 }
  0x1d   :  { %v1459_v25 = vld [vmem:[%s2951_s0 + $0xf8] sm:$0xff]  ;;  %v103_v29 = vand.u32 2147483647, %v1435_v54  ;;  %v131_v30 = vsub.f32 0.0, %v99_v49  ;;  %v179_v32 = vmul.f32 1.442695, %v127_v50  ;;  %980 = vpow2.f32 %v175_v8  ;;  %v1468_v34 = vpop.eup %970 }
  0x1e   :  { %3081 = vst [vmem:[#allocation16_spill] sm:$0xff] %v1459_v25  ;;  %v104_v37 = vand.u32 2147483647, %v1443_v61  ;;  %v132_v38 = vsub.f32 0.0, %v100_v56  ;;  %v181_v42 = vmul.f32 1.442695, %v128_v57  ;;  %982 = vpow2.f32 %v177_v22  ;;  %v1471_v54 = vpop.eup %972 }
  0x1f   :  { %v105_v45 = vand.u32 2147483647, %v1451_v15  ;;  %v133_v48 = vsub.f32 0.0, %v101_v62  ;;  %v183_v41 = vmul.f32 1.442695, %v129_v6  ;;  %v134_v52 = vsub.f32 0.0, %v102_v16 }
  0x20   :  { %v106_v49 = vand.u32 2147483647, %v1459_v25  ;;  %v185_v50 = vmul.f32 1.442695, %v130_v18  ;;  %v135_v61 = vsub.f32 0.0, %v103_v29  ;;  %984 = vpow2.f32 %v179_v32  ;;  %v1473_v57 = vpop.eup %974 }
  0x21   :  { %v187_v56 = vmul.f32 1.442695, %v131_v30  ;;  %v136_v58 = vsub.f32 0.0, %v104_v37  ;;  %986 = vpow2.f32 %v181_v42  ;;  %v189_v15 = vmul.f32 1.442695, %v132_v38  ;;  %v1475_v62 = vpop.eup %976 }
  0x22   :  { %v137_v6 = vsub.f32 0.0, %v105_v45  ;;  %988 = vpow2.f32 %v183_v41  ;;  %v191_v8 = vmul.f32 1.442695, %v133_v48  ;;  %v1477_v28 = vpop.eup %978  ;;  %v138_v16 = vsub.f32 0.0, %v106_v49 }
  0x23   :  { %990 = vpow2.f32 %v185_v50  ;;  %v193_v18 = vmul.f32 1.442695, %v134_v52  ;;  %v1479_v22 = vpop.eup %980  ;;  %v195_v29 = vmul.f32 1.442695, %v135_v61  ;;  %v197_v32 = vmul.f32 1.442695, %v136_v58 }
  0x24   :  { %992 = vpow2.f32 %v187_v56  ;;  %v1481_v30 = vpop.eup %982  ;;  %v199_v38 = vmul.f32 1.442695, %v137_v6  ;;  %v201_v41 = vmul.f32 1.442695, %v138_v16  ;;  %v1492_v61 = vadd.f32 1.0, %v1374_v63 }
  0x25   :  { %994 = vpow2.f32 %v189_v15  ;;  %v1495_v15 = vadd.f32 1.0, %v1382_v12  ;;  %v1498_v49 = vadd.f32 1.0, %v1390_v19  ;;  %v1503_v50 = vadd.f32 1.0, %v1398_v26  ;;  %v3101_v26 = vld [vmem:[#allocation9_spill] sm:$0xff] }
  0x26   :  { %v1483_v37 = vpop.eup %984  ;;  %996 = vpow2.f32 %v191_v8  ;;  %v1510_v63 = vadd.f32 1.0, %v1406_v33  ;;  %v1517_v16 = vadd.f32 1.0, %v1414_v40  ;;  %v1525_v33 = vadd.f32 1.0, %v1422_v46 }
  0x27   :  { %v1485_v42 = vpop.eup %986  ;;  %998 = vpow2.f32 %v193_v18  ;;  %3082 = vst [vmem:[#allocation17_spill] sm:$0xff] %v1498_v49  ;;  %v1533_v40 = vadd.f32 1.0, %v1430_v53  ;;  %v1541_v46 = vadd.f32 1.0, %v1438_v60  ;;  %v1549_v53 = vadd.f32 1.0, %v1446_v10  ;;  %v3109_v18 = vld [vmem:[#allocation13_spill] sm:$0xff] }
  0x28   :  { %v1487_v48 = vpop.eup %988  ;;  %1000 = vpow2.f32 %v195_v29  ;;  %3083 = vst [vmem:[#allocation18_spill] sm:$0xff] %v1503_v50  ;;  %v1557_v60 = vadd.f32 1.0, %v1454_v24  ;;  %v1565_v10 = vadd.f32 1.0, %v1462_v36  ;;  %v1573_v24 = vadd.f32 1.0, %v1465_v44 }
  0x29   :  { %v1489_v45 = vpop.eup %990  ;;  %1002 = vpow2.f32 %v197_v32  ;;  %3084 = vst [vmem:[#allocation19_spill] sm:$0xff] %v1510_v63  ;;  %v1581_v36 = vadd.f32 1.0, %v1468_v34  ;;  %v1589_v44 = vadd.f32 1.0, %v1471_v54  ;;  %v1597_v34 = vadd.f32 1.0, %v1473_v57  ;;  %v3105_v32 = vld [vmem:[#allocation11_spill] sm:$0xff] }
  0x2a   :  { %v1500_v52 = vpop.eup %992  ;;  %1004 = vpow2.f32 %v199_v38  ;;  %3085 = vst [vmem:[#allocation20_spill] sm:$0xff] %v1517_v16  ;;  %v1605_v54 = vadd.f32 1.0, %v1475_v62  ;;  %v1613_v57 = vadd.f32 1.0, %v1477_v28  ;;  %v1623_v62 = vld [vmem:[%s2952_s1] sm:$0xff]  ;;  %v1631_v28 = vadd.f32 1.0, %v1479_v22 }
  0x2b   :  { %v1507_v6 = vpop.eup %994  ;;  %1006 = vpow2.f32 %v201_v41  ;;  %3086 = vst [vmem:[#allocation21_spill] sm:$0xff] %v1525_v33  ;;  %v1649_v22 = vadd.f32 1.0, %v1481_v30  ;;  %v1670_v30 = vld [vmem:[%s2952_s1 + $0x28] sm:$0xff] }
  0x2c   :  { %v1514_v8 = vpop.eup %996  ;;  %1008 = vlog2.f32 %v1492_v61  ;;  %3087 = vst [vmem:[#allocation22_spill] sm:$0xff] %v1533_v40 }
  0x2d   :  { %v1522_v29 = vpop.eup %998  ;;  %1010 = vlog2.f32 %v1495_v15  ;;  %3088 = vst [vmem:[#allocation23_spill] sm:$0xff] %v1541_v46 }
  0x2e   :  { %v1530_v41 = vpop.eup %1000  ;;  %1012 = vlog2.f32 %v1498_v49  ;;  %3089 = vst [vmem:[#allocation24_spill] sm:$0xff] %v1549_v53  ;;  %v1785_v49 = vld [vmem:[%s2952_s1 + $0x70] sm:$0xff] }
  0x2f   :  { %v1538_v19 = vpop.eup %1002  ;;  %1014 = vlog2.f32 %v1503_v50  ;;  %3090 = vst [vmem:[#allocation25_spill] sm:$0xff] %v1557_v60  ;;  %v1761_v50 = vld [vmem:[%s2952_s1 + $0x60] sm:$0xff] }
  0x30   :  { %v1546_v12 = vpop.eup %1004  ;;  %1016 = vlog2.f32 %v1510_v63  ;;  %3092 = vst [vmem:[#allocation27_spill] sm:$0xff] %v1565_v10 }
  0x31   :  { %v1554_v58 = vpop.eup %1006  ;;  %1018 = vlog2.f32 %v1517_v16  ;;  %3094 = vst [vmem:[#allocation29_spill] sm:$0xff] %v1573_v24 }
  0x32   :  { %v1562_v56 = vpop.eup %1008  ;;  %1020 = vlog2.f32 %v1525_v33  ;;  %3096 = vst [vmem:[#allocation31_spill] sm:$0xff] %v1581_v36 }
  0x33   :  { %3091 = vst [vmem:[#allocation26_spill] sm:$0xff] %v1562_v56  ;;  %v1570_v63 = vpop.eup %1010  ;;  %1022 = vlog2.f32 %v1533_v40  ;;  %v3110_v56 = vld [vmem:[#allocation14_spill] sm:$0xff] }
  0x34   :  { %3093 = vst [vmem:[#allocation28_spill] sm:$0xff] %v1570_v63  ;;  %v1578_v16 = vpop.eup %1012  ;;  %1024 = vlog2.f32 %v1541_v46  ;;  %v3106_v63 = vld [vmem:[#allocation12_spill] sm:$0xff]  ;;  %v1665_v46 = vld [vmem:[%s2952_s1 + $0x20] sm:$0xff] }
  0x35   :  { %3095 = vst [vmem:[#allocation30_spill] sm:$0xff] %v1578_v16  ;;  %v1586_v33 = vpop.eup %1014  ;;  %1026 = vlog2.f32 %v1549_v53  ;;  %v3102_v16 = vld [vmem:[#allocation10_spill] sm:$0xff]  ;;  %v1628_v53 = vld [vmem:[%s2952_s1 + $0x8] sm:$0xff] }
  0x36   :  { %3097 = vst [vmem:[#allocation32_spill] sm:$0xff] %v1586_v33  ;;  %v1594_v40 = vpop.eup %1016  ;;  %1028 = vlog2.f32 %v1557_v60  ;;  %v1653_v60 = vmul.f32 %v1623_v62, %v1254_v0  ;;  %v1657_v38 = vmul.f32 %v1628_v53, %v1259_v1 }
  0x37   :  { %3098 = vst [vmem:[#allocation33_spill] sm:$0xff] %v1589_v44  ;;  %v1602_v33 = vpop.eup %1018  ;;  %1030 = vlog2.f32 %v1565_v10  ;;  %v1641_v10 = vld [vmem:[%s2952_s1 + $0x10] sm:$0xff] }
  0x38   :  { %3099 = vst [vmem:[#allocation34_spill] sm:$0xff] %v1594_v40  ;;  %v1610_v40 = vpop.eup %1020  ;;  %1032 = vlog2.f32 %v1573_v24 }
  0x39   :  { %3100 = vst [vmem:[#allocation35_spill] sm:$0xff] %v1597_v34  ;;  %1034 = vlog2.f32 %v1581_v36 }
  0x3a   :  { %3103 = vst [vmem:[#allocation10_spill] sm:$0xff] %v1602_v33  ;;  %v1618_v33 = vpop.eup %1022  ;;  %1036 = vlog2.f32 %v1589_v44 }
  0x3b   :  { %3104 = vst [vmem:[#allocation36_spill] sm:$0xff] %v1605_v54  ;;  %v1636_v24 = vpop.eup %1024  ;;  %1038 = vlog2.f32 %v1597_v34  ;;  %v1705_v34 = vmul.f32 %v1670_v30, %v1281_v7 }
  0x3c   :  { %3107 = vst [vmem:[#allocation37_spill] sm:$0xff] %v1610_v40  ;;  %v1660_v25 = vpop.eup %1026  ;;  %1040 = vlog2.f32 %v1605_v54  ;;  %v1737_v40 = vld [vmem:[%s2952_s1 + $0x50] sm:$0xff] }
  0x3d   :  { %3108 = vst [vmem:[#allocation38_spill] sm:$0xff] %v1613_v57  ;;  %v1684_v36 = vpop.eup %1028  ;;  %1042 = vlog2.f32 %v1613_v57 }
  0x3e   :  { %3111 = vst [vmem:[#allocation39_spill] sm:$0xff] %v1618_v33  ;;  %v1646_v33 = vld [vmem:[%s2952_s1 + $0x18] sm:$0xff]  ;;  %1044 = vlog2.f32 %v1631_v28 }
  0x3f   :  { %3112 = vst [vmem:[#allocation40_spill] sm:$0xff] %v1623_v62  ;;  %v1673_v62 = vadd.f32 1.0, %v1483_v37  ;;  %v1681_v44 = vmul.f32 %v1646_v33, %v1269_v3  ;;  %v1694_v37 = vld [vmem:[%s2952_s1 + $0x38] sm:$0xff]  ;;  %1046 = vlog2.f32 %v1649_v22 }
  0x40   :  { %3113 = vst [vmem:[#allocation41_spill] sm:$0xff] %v1628_v53  ;;  %v1677_v53 = vmul.f32 %v1641_v10, %v1264_v2  ;;  %v1729_v54 = vmul.f32 %v1694_v37, %v1293_v11 }
  0x41   :  { %3114 = vst [vmem:[#allocation42_spill] sm:$0xff] %v1631_v28  ;;  %1048 = vlog2.f32 %v1673_v62 }
  0x42   :  { %3116 = vst [vmem:[#allocation43_spill] sm:$0xff] %v1636_v24  ;;  %v1713_v24 = vld [vmem:[%s2952_s1 + $0x40] sm:$0xff] }
  0x43   :  { %3117 = vst [vmem:[#allocation44_spill] sm:$0xff] %v1641_v10  ;;  %v1697_v10 = vadd.f32 1.0, %v1485_v42  ;;  %v1718_v42 = vld [vmem:[%s2952_s1 + $0x48] sm:$0xff] }
  0x44   :  { %3118 = vst [vmem:[#allocation45_spill] sm:$0xff] %v1646_v33  ;;  %v1701_v33 = vmul.f32 %v1665_v46, %v1275_v5  ;;  %v1753_v57 = vmul.f32 %v1718_v42, %v1305_v17 }
  0x45   :  { %3119 = vst [vmem:[#allocation46_spill] sm:$0xff] %v1649_v22  ;;  %1050 = vlog2.f32 %v1697_v10 }
  0x46   :  { %3120 = vst [vmem:[#allocation47_spill] sm:$0xff] %v1660_v25  ;;  %v1689_v25 = vld [vmem:[%s2952_s1 + $0x30] sm:$0xff] }
  0x47   :  { %3121 = vst [vmem:[#allocation48_spill] sm:$0xff] %v1665_v46  ;;  %v1721_v46 = vadd.f32 1.0, %v1487_v48  ;;  %v1742_v48 = vld [vmem:[%s2952_s1 + $0x58] sm:$0xff] }
  0x48   :  { %3122 = vst [vmem:[#allocation49_spill] sm:$0xff] %v1670_v30  ;;  %v1725_v30 = vmul.f32 %v1689_v25, %v1287_v9  ;;  %v1777_v28 = vmul.f32 %v1742_v48, %v1317_v23  ;;  %v1809_v23 = vld [vmem:[%s2952_s1 + $0x80] sm:$0xff] }
  0x49   :  { %3123 = vst [vmem:[#allocation50_spill] sm:$0xff] %v1673_v62  ;;  %1052 = vlog2.f32 %v1721_v46 }
  0x4a   :  { %3124 = vst [vmem:[#allocation51_spill] sm:$0xff] %v1684_v36  ;;  %v1708_v36 = vpop.eup %1030 }
  0x4b   :  { %3125 = vst [vmem:[#allocation52_spill] sm:$0xff] %v1689_v25  ;;  %v1745_v25 = vadd.f32 1.0, %v1489_v45  ;;  %v1766_v45 = vld [vmem:[%s2952_s1 + $0x68] sm:$0xff] }
  0x4c   :  { %3126 = vst [vmem:[#allocation53_spill] sm:$0xff] %v1694_v37  ;;  %v1749_v37 = vmul.f32 %v1713_v24, %v1299_v14  ;;  %v1801_v22 = vmul.f32 %v1766_v45, %v1329_v31  ;;  %v1833_v31 = vld [vmem:[%s2952_s1 + $0x90] sm:$0xff] }
  0x4d   :  { %3127 = vst [vmem:[#allocation54_spill] sm:$0xff] %v1697_v10  ;;  %v1850_v10 = vmul.f32 %v1809_v23, %v1347_v43  ;;  %1054 = vlog2.f32 %v1745_v25 }
  0x4e   :  { %3128 = vst [vmem:[#allocation55_spill] sm:$0xff] %v1708_v36  ;;  %v1732_v36 = vpop.eup %1032 }
  0x4f   :  { %3129 = vst [vmem:[#allocation56_spill] sm:$0xff] %v1713_v24  ;;  %v1769_v24 = vadd.f32 1.0, %v1500_v52  ;;  %v1790_v52 = vld [vmem:[%s2952_s1 + $0x78] sm:$0xff] }
  0x50   :  { %3130 = vst [vmem:[#allocation57_spill] sm:$0xff] %v1718_v42  ;;  %v1773_v42 = vmul.f32 %v1737_v40, %v1311_v20  ;;  %v1825_v62 = vmul.f32 %v1790_v52, %v1341_v39 }
  0x51   :  { %3131 = vst [vmem:[#allocation58_spill] sm:$0xff] %v1721_v46  ;;  %1056 = vlog2.f32 %v1769_v24 }
  0x52   :  { %3132 = vst [vmem:[#allocation59_spill] sm:$0xff] %v1732_v36  ;;  %v1756_v36 = vpop.eup %1034 }
  0x53   :  { %3133 = vst [vmem:[#allocation60_spill] sm:$0xff] %v1737_v40  ;;  %v1793_v40 = vadd.f32 1.0, %v1507_v6  ;;  %v1814_v6 = vld [vmem:[%s2952_s1 + $0x88] sm:$0xff] }
  0x54   :  { %3134 = vst [vmem:[#allocation61_spill] sm:$0xff] %v1742_v48  ;;  %v1797_v48 = vmul.f32 %v1761_v50, %v1323_v27 }
  0x55   :  { %3135 = vst [vmem:[#allocation62_spill] sm:$0xff] %v1745_v25  ;;  %1058 = vlog2.f32 %v1793_v40 }
  0x56   :  { %3136 = vst [vmem:[#allocation63_spill] sm:$0xff] %v1756_v36  ;;  %v1780_v36 = vpop.eup %1036 }
  0x57   :  { %3137 = vst [vmem:[#allocation64_spill] sm:$0xff] %v1761_v50  ;;  %v1817_v50 = vadd.f32 1.0, %v1514_v8  ;;  %v1838_v8 = vld [vmem:[%s2952_s1 + $0x98] sm:$0xff] }
  0x58   :  { %3138 = vst [vmem:[#allocation65_spill] sm:$0xff] %v1766_v45  ;;  %v1821_v45 = vmul.f32 %v1785_v49, %v1335_v35 }
  0x59   :  { %3139 = vst [vmem:[#allocation66_spill] sm:$0xff] %v1769_v24  ;;  %1060 = vlog2.f32 %v1817_v50 }
  0x5a   :  { %3140 = vst [vmem:[#allocation67_spill] sm:$0xff] %v1780_v36  ;;  %v1804_v36 = vpop.eup %1038 }
  0x5b   :  { %3141 = vst [vmem:[#allocation68_spill] sm:$0xff] %v1785_v49  ;;  %v1843_v49 = vld [vmem:[%s2952_s1 + $0xa0] sm:$0xff] }
  0x5c   :  { %3142 = vst [vmem:[#allocation69_spill] sm:$0xff] %v1790_v52  ;;  %v1846_v52 = vadd.f32 1.0, %v1522_v29  ;;  %v1867_v29 = vld [vmem:[%s2952_s1 + $0xb0] sm:$0xff]  ;;  %v1879_v46 = vmul.f32 %v1843_v49, %v1371_v59  ;;  %v1909_v59 = vld [vmem:[%s2952_s1 + $0xc8] sm:$0xff] }
  0x5d   :  { %3143 = vst [vmem:[#allocation70_spill] sm:$0xff] %v1793_v40  ;;  %v1901_v25 = vmul.f32 %v1867_v29, %v1387_v13  ;;  %v71_v13 = vld [vmem:[%s2952_s1 + $0xe0] sm:$0xff] }
  0x5e   :  { %3144 = vst [vmem:[#allocation71_spill] sm:$0xff] %v1804_v36  ;;  %v1828_v36 = vpop.eup %1040  ;;  %1062 = vlog2.f32 %v1846_v52 }
  0x5f   :  { %3145 = vst [vmem:[#allocation72_spill] sm:$0xff] %v1809_v23  ;;  %v1857_v39 = vpop.eup %1042  ;;  %v1871_v23 = vmul.f32 %v1833_v31, %v1359_v51 }
  0x60   :  { %3146 = vst [vmem:[#allocation73_spill] sm:$0xff] %v1814_v6 }
  0x61   :  { %3147 = vst [vmem:[#allocation74_spill] sm:$0xff] %v1825_v62  ;;  %v1862_v62 = vld [vmem:[%s2952_s1 + $0xa8] sm:$0xff] }
  0x62   :  { %3148 = vst [vmem:[#allocation75_spill] sm:$0xff] %v1828_v36  ;;  %v1854_v36 = vmul.f32 %v1814_v6, %v1353_v47  ;;  %v1875_v6 = vmul.f32 %v1838_v8, %v1365_v55  ;;  %v1887_v47 = vld [vmem:[%s2952_s1 + $0xb8] sm:$0xff] }
  0x63   :  { %3149 = vst [vmem:[#allocation76_spill] sm:$0xff] %v1833_v31  ;;  %v1892_v31 = vld [vmem:[%s2952_s1 + $0xc0] sm:$0xff] }
  0x64   :  { %3150 = vst [vmem:[#allocation77_spill] sm:$0xff] %v1838_v8  ;;  %v1895_v8 = vadd.f32 1.0, %v1530_v41  ;;  %v69_v41 = vld [vmem:[%s2952_s1 + $0xd0] sm:$0xff] }
  0x65   :  { %3151 = vst [vmem:[#allocation78_spill] sm:$0xff] %v1843_v49  ;;  %v288_v49 = vmul.f32 %v1862_v62, %v1379_v4  ;;  %v1939_v40 = vmul.f32 %v69_v41, %v3105_v32  ;;  %v1957_v41 = vadd.f32 1.0, %v1554_v58  ;;  %v3169_v32 = vmax.f32 %v1254_v0, 0.0 }
  0x66   :  { %3152 = vst [vmem:[#allocation79_spill] sm:$0xff] %v1857_v39  ;;  %v1882_v39 = vpop.eup %1044  ;;  %1064 = vlog2.f32 %v1895_v8  ;;  %v3172_v58 = vmax.f32 %v1269_v3, 0.0  ;;  %v3173_v0 = vmax.f32 %v1275_v5, 0.0  ;;  %v3177_v3 = vmax.f32 %v1293_v11, 0.0 }
  0x67   :  { %3153 = vst [vmem:[#allocation80_spill] sm:$0xff] %v1862_v62  ;;  %v291_v62 = vmul.f32 %v1892_v31, %v3101_v26 }
  0x68   :  { %3154 = vst [vmem:[#allocation81_spill] sm:$0xff] %v1867_v29  ;;  %v290_v29 = vmul.f32 %v1887_v47, %v1395_v21  ;;  %v1948_v21 = vmul.f32 %v71_v13, %v3109_v18  ;;  %v3220_v18 = vld [vmem:[#allocation9_spill] sm:$0xff] }
  0x69   :  { %3155 = vst [vmem:[#allocation82_spill] sm:$0xff] %v1879_v46  ;;  %v1915_v46 = vadd.f32 1.0, %v1538_v19  ;;  %v72_v19 = vld [vmem:[%s2952_s1 + $0xe8] sm:$0xff] }
  0x6a   :  { %3156 = vst [vmem:[#allocation83_spill] sm:$0xff] %v1882_v39  ;;  %v1904_v39 = vpop.eup %1046 }
  0x6b   :  { %3157 = vst [vmem:[#allocation84_spill] sm:$0xff] %v1887_v47  ;;  %v1922_v24 = vpop.eup %1048  ;;  %v1934_v47 = vadd.f32 1.0, %v1546_v12  ;;  %1066 = vlog2.f32 %v1915_v46 }
  0x6c   :  { %3158 = vst [vmem:[#allocation85_spill] sm:$0xff] %v1892_v31  ;;  %v292_v31 = vmul.f32 %v1909_v59, %v3102_v16  ;;  %1068 = vrcp.f32 %v1492_v61 }
  0x6d   :  { %3159 = vst [vmem:[#allocation86_spill] sm:$0xff] %v1901_v25  ;;  %v1951_v25 = vmul.f32 %v72_v19, %v3110_v56  ;;  %v3171_v19 = vmax.f32 %v1264_v2, 0.0  ;;  %v3176_v2 = vmax.f32 %v1287_v9, 0.0  ;;  %1070 = vrcp.f32 %v1495_v15 }
  0x6e   :  { %3160 = vst [vmem:[#allocation87_spill] sm:$0xff] %v1904_v39  ;;  %v70_v39 = vld [vmem:[%s2952_s1 + $0xd8] sm:$0xff] }
  0x6f   :  { %3161 = vst [vmem:[#allocation88_spill] sm:$0xff] %v1909_v59  ;;  %v1945_v26 = vmul.f32 %v70_v39, %v3106_v63  ;;  %v3170_v39 = vmax.f32 %v1259_v1, 0.0  ;;  %v301_v56 = vsub.f32 %v3171_v19, %v1677_v53  ;;  %v1988_v53 = vsub.f32 %v3176_v2, %v1725_v30  ;;  %v3183_v30 = vld [vmem:[#allocation2_spill] sm:$0xff]  ;;  %v3239_v59 = vld [vmem:[#allocation51_spill] sm:$0xff] }
  0x70   :  { %3162 = vst [vmem:[#allocation89_spill] sm:$0xff] %v1922_v24  ;;  %v1942_v24 = vpop.eup %1050  ;;  %v3184_v19 = vmax.f32 %v3183_v30, 0.0  ;;  %v3197_v30 = vld [vmem:[#allocation5_spill] sm:$0xff] }
  0x71   :  { %3163 = vst [vmem:[#allocation90_spill] sm:$0xff] %v1934_v47  ;;  %v1954_v12 = vpop.eup %1052  ;;  %v300_v63 = vsub.f32 %v3170_v39, %v1657_v38  ;;  %v3175_v38 = vmax.f32 %v1281_v7, 0.0  ;;  %v3180_v7 = vmax.f32 %v1305_v17, 0.0 }
  0x72   :  { %3164 = vst [vmem:[#allocation91_spill] sm:$0xff] %v1939_v40  ;;  %v299_v40 = vsub.f32 %v3169_v32, %v1653_v60  ;;  %v1966_v13 = vpop.eup %1054  ;;  %v1977_v32 = vsub.f32 %v3173_v0, %v1701_v33  ;;  %v3179_v33 = vmax.f32 %v1299_v14, 0.0  ;;  %v2019_v14 = vsub.f32 %v3184_v19, %v1777_v28  ;;  %v3191_v28 = vld [vmem:[#allocation74_spill] sm:$0xff] }
  0x73   :  { %3165 = vst [vmem:[#allocation92_spill] sm:$0xff] %v1945_v26  ;;  %v1980_v1 = vpop.eup %1056  ;;  %v304_v60 = vsub.f32 %v3175_v38, %v1705_v34  ;;  %v2006_v9 = vsub.f32 %v3180_v7, %v1753_v57  ;;  %v3181_v34 = vmax.f32 %v1311_v20, 0.0  ;;  %v3186_v57 = vld [vmem:[#allocation3_spill] sm:$0xff]  ;;  %v3190_v38 = vmax.f32 %v1335_v35, 0.0  ;;  %v3223_v26 = vld [vmem:[#allocation32_spill] sm:$0xff] }
  0x74   :  { %3166 = vst [vmem:[#allocation93_spill] sm:$0xff] %v1948_v21  ;;  %v1996_v5 = vpop.eup %1058  ;;  %v2001_v39 = vsub.f32 %v3179_v33, %v1749_v37  ;;  %v3185_v37 = vmax.f32 %v1323_v27, 0.0  ;;  %v3198_v19 = vmax.f32 %v3197_v30, 0.0  ;;  %v3209_v30 = vld [vmem:[#allocation20_spill] sm:$0xff]  ;;  %v3221_v21 = vmax.f32 %v3220_v18, 0.0 }
  0x75   :  { %3167 = vst [vmem:[#allocation94_spill] sm:$0xff] %v1951_v25  ;;  %v302_v25 = vsub.f32 %v3172_v58, %v1681_v44  ;;  %v1993_v44 = vsub.f32 %v3177_v3, %v1729_v54  ;;  %v2011_v11 = vsub.f32 %v3181_v34, %v1773_v42  ;;  %v2014_v54 = vpop.eup %1060  ;;  %v3187_v58 = vmax.f32 %v3186_v57, 0.0  ;;  %v3188_v42 = vld [vmem:[#allocation17_spill] sm:$0xff]  ;;  %v3192_v3 = vld [vmem:[#allocation4_spill] sm:$0xff] }
  0x76   :  { %3168 = vst [vmem:[#allocation95_spill] sm:$0xff] %v1957_v41  ;;  %v2024_v17 = vsub.f32 %v3185_v37, %v1797_v48  ;;  %1072 = vrcp.f32 %v3188_v42  ;;  %v2032_v0 = vpop.eup %1062  ;;  %v2037_v2 = vsub.f32 %v3190_v38, %v1821_v45  ;;  %v3193_v33 = vmax.f32 %v3192_v3, 0.0  ;;  %v3203_v38 = vld [vmem:[#allocation82_spill] sm:$0xff]  ;;  %v3242_v41 = vld [vmem:[#allocation55_spill] sm:$0xff] }
  0x77   :  { %3174 = vst [vmem:[#allocation96_spill] sm:$0xff] %v1980_v1  ;;  %v2029_v20 = vsub.f32 %v3187_v58, %v1801_v22  ;;  %v3194_v48 = vmax.f32 %v1347_v43, 0.0  ;;  %v3195_v22 = vld [vmem:[#allocation18_spill] sm:$0xff]  ;;  %v2050_v34 = vpop.eup %1064  ;;  %v2055_v35 = vsub.f32 %v3198_v19, %v1854_v36  ;;  %v3199_v45 = vmax.f32 %v1359_v51, 0.0  ;;  %v3211_v19 = vld [vmem:[#allocation7_spill] sm:$0xff] }
  0x78   :  { %3178 = vst [vmem:[#allocation97_spill] sm:$0xff] %v1996_v5  ;;  %v2042_v27 = vsub.f32 %v3193_v33, %v3191_v28  ;;  %1074 = vrcp.f32 %v3195_v22  ;;  %v3200_v57 = vmax.f32 %v1365_v55, 0.0  ;;  %v2068_v58 = vpop.eup %1066  ;;  %v3204_v28 = vld [vmem:[#allocation6_spill] sm:$0xff]  ;;  %v3206_v36 = vmax.f32 %v1379_v4, 0.0 }
  0x79   :  { %3182 = vst [vmem:[#allocation98_spill] sm:$0xff] %v2014_v54  ;;  %v2047_v7 = vsub.f32 %v3194_v48, %v1850_v10  ;;  %v2060_v37 = vsub.f32 %v3199_v45, %v1871_v23  ;;  %v3201_v10 = vld [vmem:[#allocation19_spill] sm:$0xff]  ;;  %v3205_v3 = vmax.f32 %v3204_v28, 0.0  ;;  %v3208_v23 = vld [vmem:[#allocation26_spill] sm:$0xff]  ;;  %v2081_v55 = vpop.eup %1068  ;;  %v3212_v45 = vmax.f32 %v3211_v19, 0.0 }
  0x7a   :  { %3189 = vst [vmem:[#allocation2_spill] sm:$0xff] %v2032_v0  ;;  %v2065_v43 = vsub.f32 %v3200_v57, %v1875_v6  ;;  %1076 = vrcp.f32 %v3201_v10  ;;  %v2077_v48 = vsub.f32 %v3206_v36, %v288_v49  ;;  %v332_v51 = vmul.f32 0.6931472, %v3208_v23  ;;  %v3210_v6 = vld [vmem:[#allocation86_spill] sm:$0xff]  ;;  %v2091_v4 = vpop.eup %1070  ;;  %v3217_v49 = vld [vmem:[#allocation8_spill] sm:$0xff] }
  0x7b   :  { %3196 = vst [vmem:[#allocation3_spill] sm:$0xff] %v2050_v34  ;;  %v2073_v33 = vsub.f32 %v3205_v3, %v3203_v38  ;;  %1078 = vrcp.f32 %v3209_v30  ;;  %v2086_v57 = vsub.f32 %v3212_v45, %v3210_v6  ;;  %v3215_v28 = vld [vmem:[#allocation30_spill] sm:$0xff]  ;;  %v3216_v3 = vld [vmem:[#allocation21_spill] sm:$0xff]  ;;  %v3218_v36 = vmax.f32 %v3217_v49, 0.0 }
  0x7c   :  { %3202 = vst [vmem:[#allocation17_spill] sm:$0xff] %v2068_v58  ;;  %v3214_v58 = vld [vmem:[#allocation28_spill] sm:$0xff]  ;;  %v336_v38 = vmul.f32 0.6931472, %v3215_v28  ;;  %1080 = vrcp.f32 %v3216_v3  ;;  %v2099_v0 = vsub.f32 %v3221_v21, %v291_v62  ;;  %v338_v19 = vmul.f32 0.6931472, %v3223_v26  ;;  %v2103_v45 = vpop.eup %1072 }
  0x7d   :  { %3207 = vst [vmem:[#allocation74_spill] sm:$0xff] %v2077_v48  ;;  %v334_v34 = vmul.f32 0.6931472, %v3214_v58  ;;  %v2095_v23 = vsub.f32 %v3218_v36, %v290_v29  ;;  %v3224_v6 = vld [vmem:[#allocation22_spill] sm:$0xff]  ;;  %v3225_v58 = vmax.f32 %v3102_v16, 0.0  ;;  %v3229_v29 = vld [vmem:[#allocation23_spill] sm:$0xff] }
  0x7e   :  { %3213 = vst [vmem:[#allocation4_spill] sm:$0xff] %v2086_v57  ;;  %1082 = vrcp.f32 %v3224_v6  ;;  %v3227_v54 = vld [vmem:[#allocation34_spill] sm:$0xff]  ;;  %v2112_v36 = vpop.eup %1074  ;;  %v3230_v21 = vld [vmem:[#allocation37_spill] sm:$0xff]  ;;  %v3231_v62 = vld [vmem:[#allocation39_spill] sm:$0xff] }
  0x7f   :  { %3219 = vst [vmem:[#allocation18_spill] sm:$0xff] %v2095_v23  ;;  %v2107_v28 = vsub.f32 %v3225_v58, %v292_v31  ;;  %v340_v5 = vmul.f32 0.6931472, %v3227_v54  ;;  %v3228_v57 = vld [vmem:[#allocation10_spill] sm:$0xff]  ;;  %1084 = vrcp.f32 %v3229_v29  ;;  %v344_v18 = vmul.f32 0.6931472, %v3230_v21 }
  0x80   :  { %3222 = vst [vmem:[#allocation5_spill] sm:$0xff] %v2099_v0  ;;  %v342_v49 = vmul.f32 0.6931472, %v3228_v57  ;;  %v346_v26 = vmul.f32 0.6931472, %v3231_v62  ;;  %v2116_v0 = vadd.f32 %v332_v51, %v299_v40  ;;  %v3233_v23 = vld [vmem:[#allocation24_spill] sm:$0xff]  ;;  %v2119_v1 = vpop.eup %1076  ;;  %v2122_v58 = vadd.f32 %v334_v34, %v300_v63 }
  0x81   :  { %3226 = vst [vmem:[#allocation19_spill] sm:$0xff] %v2107_v28  ;;  %1086 = vrcp.f32 %v3233_v23  ;;  %v3234_v31 = vld [vmem:[#allocation43_spill] sm:$0xff]  ;;  %v2124_v54 = vadd.f32 %v336_v38, %v301_v56  ;;  %v3237_v57 = vld [vmem:[#allocation25_spill] sm:$0xff]  ;;  %v2127_v28 = vpop.eup %1078  ;;  %v352_v62 = vmul.f32 0.6931472, %v3239_v59  ;;  %v2131_v40 = vadd.f32 %v338_v19, %v302_v25 }
  0x82   :  { %3232 = vst [vmem:[#allocation82_spill] sm:$0xff] %v2116_v0  ;;  %v348_v16 = vmul.f32 0.6931472, %v3234_v31  ;;  %1088 = vrcp.f32 %v3237_v57  ;;  %v3238_v48 = vld [vmem:[#allocation47_spill] sm:$0xff]  ;;  %v2134_v0 = vpop.eup %1080  ;;  %v354_v31 = vmul.f32 0.6931472, %v3242_v41  ;;  %v2138_v63 = vadd.f32 %v340_v5, %v1977_v32 }
  0x83   :  { %3235 = vst [vmem:[#allocation6_spill] sm:$0xff] %v2122_v58  ;;  %v350_v21 = vmul.f32 0.6931472, %v3238_v48  ;;  %v3241_v51 = vld [vmem:[#allocation27_spill] sm:$0xff]  ;;  %v2140_v56 = vadd.f32 %v342_v49, %v304_v60  ;;  %v3245_v34 = vld [vmem:[#allocation29_spill] sm:$0xff]  ;;  %v2147_v59 = vadd.f32 %v344_v18, %v1988_v53  ;;  %v2150_v25 = vadd.f32 %v346_v26, %v1993_v44 }
  0x84   :  { %3236 = vst [vmem:[#allocation26_spill] sm:$0xff] %v2124_v54  ;;  %1090 = vrcp.f32 %v3241_v51  ;;  %v2143_v38 = vpop.eup %1082  ;;  %v3246_v48 = vld [vmem:[#allocation59_spill] sm:$0xff]  ;;  %v2168_v26 = vadd.f32 %v352_v62, %v2011_v11 }
  0x85   :  { %3240 = vst [vmem:[#allocation20_spill] sm:$0xff] %v2131_v40  ;;  %1092 = vrcp.f32 %v3245_v34  ;;  %v356_v54 = vmul.f32 0.6931472, %v3246_v48  ;;  %v3249_v19 = vld [vmem:[#allocation31_spill] sm:$0xff]  ;;  %v2153_v41 = vpop.eup %1084  ;;  %v2165_v44 = vadd.f32 %v350_v21, %v2006_v9  ;;  %v3268_v40 = vld [vmem:[#allocation42_spill] sm:$0xff] }
  0x86   :  { %3243 = vst [vmem:[#allocation86_spill] sm:$0xff] %v2138_v63  ;;  %1094 = vrcp.f32 %v3249_v19  ;;  %v3250_v32 = vld [vmem:[#allocation63_spill] sm:$0xff]  ;;  %v3253_v63 = vld [vmem:[#allocation33_spill] sm:$0xff] }
  0x87   :  { %3244 = vst [vmem:[#allocation7_spill] sm:$0xff] %v2140_v56  ;;  %v358_v5 = vmul.f32 0.6931472, %v3250_v32  ;;  %v3251_v60 = vld [vmem:[#allocation67_spill] sm:$0xff]  ;;  %v2158_v56 = vadd.f32 %v348_v16, %v2001_v39  ;;  %1096 = vrcp.f32 %v3253_v63  ;;  %v2161_v48 = vpop.eup %1086  ;;  %v2175_v39 = vadd.f32 %v354_v31, %v2019_v14  ;;  %v3260_v16 = vld [vmem:[#allocation36_spill] sm:$0xff] }
  0x88   :  { %3247 = vst [vmem:[#allocation28_spill] sm:$0xff] %v2147_v59  ;;  %v360_v49 = vmul.f32 0.6931472, %v3251_v60  ;;  %v3254_v53 = vld [vmem:[#allocation71_spill] sm:$0xff]  ;;  %v2171_v32 = vpop.eup %1088 }
  0x89   :  { %3248 = vst [vmem:[#allocation30_spill] sm:$0xff] %v2150_v25  ;;  %v362_v18 = vmul.f32 0.6931472, %v3254_v53  ;;  %v3257_v25 = vld [vmem:[#allocation35_spill] sm:$0xff]  ;;  %v459_v53 = vmul.f32 %v2081_v55, %v1492_v61 }
  0x8a   :  { %3252 = vst [vmem:[#allocation21_spill] sm:$0xff] %v2158_v56  ;;  %1098 = vrcp.f32 %v3257_v25  ;;  %v3258_v60 = vld [vmem:[#allocation75_spill] sm:$0xff]  ;;  %v2180_v56 = vpop.eup %1090  ;;  %v2195_v61 = vadd.f32 %v360_v49, %v2037_v2  ;;  %v3273_v2 = vld [vmem:[#allocation50_spill] sm:$0xff] }
  0x8b   :  { %3255 = vst [vmem:[#allocation8_spill] sm:$0xff] %v2165_v44  ;;  %v364_v59 = vmul.f32 0.6931472, %v3258_v60  ;;  %1100 = vrcp.f32 %v3260_v16  ;;  %v3261_v9 = vld [vmem:[#allocation79_spill] sm:$0xff]  ;;  %v3264_v44 = vld [vmem:[#allocation38_spill] sm:$0xff]  ;;  %v2188_v60 = vpop.eup %1092  ;;  %v491_v49 = vsub.f32 2.0, %v459_v53 }
  0x8c   :  { %3256 = vst [vmem:[#allocation9_spill] sm:$0xff] %v2168_v26  ;;  %v366_v21 = vmul.f32 0.6931472, %v3261_v9  ;;  %v3262_v11 = vld [vmem:[#allocation83_spill] sm:$0xff]  ;;  %v2185_v26 = vadd.f32 %v356_v54, %v2024_v17  ;;  %1102 = vrcp.f32 %v3264_v44  ;;  %v2198_v9 = vpop.eup %1094  ;;  %v2202_v17 = vadd.f32 %v362_v18, %v2042_v27  ;;  %v3271_v54 = vld [vmem:[#allocation46_spill] sm:$0xff] }
  0x8d   :  { %3259 = vst [vmem:[#allocation32_spill] sm:$0xff] %v2175_v39  ;;  %v368_v62 = vmul.f32 0.6931472, %v3262_v11  ;;  %v3265_v14 = vld [vmem:[#allocation87_spill] sm:$0xff]  ;;  %v2192_v39 = vadd.f32 %v358_v5, %v2029_v20  ;;  %1104 = vrcp.f32 %v3268_v40  ;;  %v3269_v11 = vld [vmem:[#allocation89_spill] sm:$0xff]  ;;  %v2210_v20 = vadd.f32 %v364_v59, %v2047_v7 }
  0x8e   :  { %3263 = vst [vmem:[#allocation22_spill] sm:$0xff] %v2185_v26  ;;  %v370_v31 = vmul.f32 0.6931472, %v3265_v14  ;;  %v372_v58 = vmul.f32 0.6931472, %v3269_v11  ;;  %1106 = vrcp.f32 %v3271_v54  ;;  %v460_v14 = vmul.f32 %v2091_v4, %v1495_v15  ;;  %v2207_v26 = vpop.eup %1096  ;;  %v3276_v15 = vld [vmem:[#allocation54_spill] sm:$0xff] }
  0x8f   :  { %3266 = vst [vmem:[#allocation34_spill] sm:$0xff] %v2192_v39  ;;  %1108 = vrcp.f32 %v3273_v2  ;;  %v461_v5 = vmul.f32 %v2103_v45, %v3188_v42  ;;  %v2218_v27 = vadd.f32 %v366_v21, %v2055_v35  ;;  %v2221_v18 = vadd.f32 %v368_v62, %v2060_v37  ;;  %v3280_v35 = vld [vmem:[#allocation58_spill] sm:$0xff] }
  0x90   :  { %3267 = vst [vmem:[#allocation10_spill] sm:$0xff] %v2195_v61  ;;  %v2215_v11 = vpop.eup %1098  ;;  %1110 = vrcp.f32 %v3276_v15  ;;  %v462_v7 = vmul.f32 %v2112_v36, %v3195_v22  ;;  %v2232_v42 = vmul.f32 0.6931472, %v1954_v12  ;;  %v2235_v53 = vadd.f32 %v370_v31, %v2065_v43  ;;  %v3283_v62 = vld [vmem:[#allocation62_spill] sm:$0xff] }
  0x91   :  { %3270 = vst [vmem:[#allocation23_spill] sm:$0xff] %v2202_v17  ;;  %v2226_v59 = vpop.eup %1100  ;;  %1112 = vrcp.f32 %v3280_v35  ;;  %v2241_v21 = vmul.f32 0.6931472, %v1966_v13  ;;  %v2244_v22 = vadd.f32 %v372_v58, %v2073_v33  ;;  %v3284_v12 = vld [vmem:[#allocation66_spill] sm:$0xff]  ;;  %v463_v43 = vmul.f32 %v2119_v1, %v3201_v10 }
  0x92   :  { %3272 = vst [vmem:[#allocation37_spill] sm:$0xff] %v2210_v20  ;;  %v2229_v20 = vmul.f32 0.6931472, %v1942_v24  ;;  %v2238_v37 = vpop.eup %1102  ;;  %1114 = vrcp.f32 %v3283_v62  ;;  %v492_v24 = vsub.f32 2.0, %v460_v14  ;;  %v493_v31 = vsub.f32 2.0, %v461_v5  ;;  %v3286_v13 = vld [vmem:[#allocation70_spill] sm:$0xff] }
  0x93   :  { %3274 = vst [vmem:[#allocation39_spill] sm:$0xff] %v2218_v27  ;;  %1116 = vrcp.f32 %v3284_v12  ;;  %v464_v33 = vmul.f32 %v2127_v28, %v3209_v30  ;;  %v465_v58 = vmul.f32 %v2134_v0, %v3216_v3  ;;  %v494_v14 = vsub.f32 2.0, %v462_v7 }
  0x94   :  { %3275 = vst [vmem:[#allocation24_spill] sm:$0xff] %v2221_v18  ;;  %v2247_v18 = vpop.eup %1104  ;;  %1118 = vrcp.f32 %v3286_v13  ;;  %v466_v10 = vmul.f32 %v2143_v38, %v3224_v6  ;;  %v468_v5 = vmul.f32 %v2161_v48, %v3233_v23  ;;  %v469_v30 = vmul.f32 %v2171_v32, %v3237_v57 }
  0x95   :  { %3277 = vst [vmem:[#allocation43_spill] sm:$0xff] %v2229_v20  ;;  %1120 = vrcp.f32 %v1817_v50  ;;  %v470_v3 = vmul.f32 %v2180_v56, %v3241_v51  ;;  %v471_v7 = vmul.f32 %v2188_v60, %v3245_v34  ;;  %v472_v23 = vmul.f32 %v2198_v9, %v3249_v19 }
  0x96   :  { %3278 = vst [vmem:[#allocation25_spill] sm:$0xff] %v2232_v42  ;;  %v2253_v42 = vmul.f32 %v2081_v55, %v491_v49  ;;  %v467_v55 = vmul.f32 %v2153_v41, %v3229_v29  ;;  %1122 = vrcp.f32 %v1846_v52  ;;  %v495_v29 = vsub.f32 2.0, %v463_v43 }
  0x97   :  { %3279 = vst [vmem:[#allocation47_spill] sm:$0xff] %v2235_v53  ;;  %v2255_v53 = vpop.eup %1106  ;;  %1124 = vrcp.f32 %v1895_v8  ;;  %v473_v57 = vmul.f32 %v2207_v26, %v3253_v63  ;;  %v496_v51 = vsub.f32 2.0, %v464_v33  ;;  %v497_v34 = vsub.f32 2.0, %v465_v58 }
  0x98   :  { %3281 = vst [vmem:[#allocation51_spill] sm:$0xff] %v2241_v21  ;;  %v2262_v21 = vpop.eup %1108  ;;  %1126 = vrcp.f32 %v1915_v46  ;;  %v498_v17 = vsub.f32 2.0, %v466_v10  ;;  %v499_v61 = vsub.f32 2.0, %v467_v55  ;;  %v500_v19 = vsub.f32 2.0, %v468_v5 }
  0x99   :  { %3282 = vst [vmem:[#allocation27_spill] sm:$0xff] %v2244_v22  ;;  %v2271_v49 = vpop.eup %1110  ;;  %v2286_v22 = vmul.f32 %v2091_v4, %v492_v24  ;;  %1128 = vrcp.f32 %v1934_v47  ;;  %v3288_v4 = vld [vmem:[#allocation95_spill] sm:$0xff]  ;;  %v501_v24 = vsub.f32 2.0, %v469_v30  ;;  %v502_v39 = vsub.f32 2.0, %v470_v3 }
  0x9a   :  { %3285 = vst [vmem:[#allocation55_spill] sm:$0xff] %v2253_v42  ;;  %v2280_v6 = vpop.eup %1112  ;;  %1130 = vrcp.f32 %v3288_v4  ;;  %v474_v63 = vmul.f32 %v2215_v11, %v3257_v25  ;;  %v475_v33 = vmul.f32 %v2226_v59, %v3260_v16  ;;  %v504_v58 = vsub.f32 2.0, %v472_v23  ;;  %v3289_v23 = vld [vmem:[#allocation95_spill] sm:$0xff] }
  0x9b   :  { %3287 = vst [vmem:[#allocation29_spill] sm:$0xff] %v2286_v22  ;;  %v2288_v20 = vpop.eup %1114  ;;  %v503_v22 = vsub.f32 2.0, %v471_v7  ;;  %v2306_v10 = vmul.f32 %v2103_v45, %v493_v31  ;;  %v505_v5 = vsub.f32 2.0, %v473_v57  ;;  %v2311_v4 = vmul.f32 %v2112_v36, %v494_v14 }
  0x9c   :  { %v2293_v27 = vpop.eup %1116  ;;  %v2314_v30 = vmul.f32 %v2119_v1, %v495_v29  ;;  %v2317_v3 = vmul.f32 %v2127_v28, %v496_v51  ;;  %v2322_v16 = vmul.f32 %v2134_v0, %v497_v34  ;;  %v2325_v45 = vmul.f32 %v2143_v38, %v498_v17 }
  0x9d   :  { %v2296_v43 = vpop.eup %1118  ;;  %v2328_v31 = vmul.f32 %v2153_v41, %v499_v61  ;;  %v2331_v36 = vmul.f32 %v2161_v48, %v500_v19  ;;  %v476_v1 = vmul.f32 %v2238_v37, %v3264_v44  ;;  %v2338_v28 = vmul.f32 %v2171_v32, %v501_v24 }
  0x9e   :  { %v2299_v42 = vpop.eup %1120  ;;  %v2341_v0 = vmul.f32 %v2180_v56, %v502_v39  ;;  %v2344_v38 = vmul.f32 %v2188_v60, %v503_v22  ;;  %v477_v41 = vmul.f32 %v2247_v18, %v3268_v40  ;;  %v506_v48 = vsub.f32 2.0, %v474_v63 }
  0x9f   :  { %v2308_v55 = vpop.eup %1122  ;;  %v507_v61 = vsub.f32 2.0, %v475_v33  ;;  %v2351_v7 = vmul.f32 %v2198_v9, %v504_v58  ;;  %v478_v32 = vmul.f32 %v2255_v53, %v3271_v54  ;;  %v479_v56 = vmul.f32 %v2262_v21, %v3273_v2 }
  0xa0   :  { %v2319_v25 = vpop.eup %1124  ;;  %v480_v39 = vmul.f32 %v2271_v49, %v3276_v15  ;;  %v2360_v60 = vmul.f32 %v2207_v26, %v505_v5  ;;  %v481_v40 = vmul.f32 %v2280_v6, %v3280_v35  ;;  %v482_v9 = vmul.f32 %v2288_v20, %v3283_v62  ;;  %v2387_v5 = vld [vmem:[%s2951_s0] sm:$0xff] }
  0xa1   :  { %v2333_v14 = vpop.eup %1126  ;;  %v483_v22 = vmul.f32 %v2293_v27, %v3284_v12  ;;  %v484_v54 = vmul.f32 %v2296_v43, %v3286_v13  ;;  %v485_v2 = vmul.f32 %v2299_v42, %v1817_v50  ;;  %v486_v15 = vmul.f32 %v2308_v55, %v1846_v52 }
  0xa2   :  { %v2346_v17 = vpop.eup %1128  ;;  %v487_v26 = vmul.f32 %v2319_v25, %v1895_v8  ;;  %v488_v35 = vmul.f32 %v2333_v14, %v1915_v46  ;;  %v508_v29 = vsub.f32 2.0, %v476_v1  ;;  %v2382_v13 = vmul.f32 %v2215_v11, %v506_v48  ;;  %v2393_v11 = vld [vmem:[%s2951_s0 + $0x8] sm:$0xff] }
  0xa3   :  { %v1131_v44 = vpop.eup %1130  ;;  %v489_v62 = vmul.f32 %v2346_v17, %v1934_v47  ;;  %v509_v57 = vsub.f32 2.0, %v477_v41  ;;  %v510_v50 = vsub.f32 2.0, %v478_v32  ;;  %v511_v51 = vsub.f32 2.0, %v479_v56  ;;  %v2405_v56 = vld [vmem:[%s2951_s0 + $0x10] sm:$0xff] }
  0xa4   :  { %v490_v12 = vmul.f32 %v1131_v44, %v3289_v23  ;;  %v512_v34 = vsub.f32 2.0, %v480_v39  ;;  %v513_v52 = vsub.f32 2.0, %v481_v40  ;;  %v514_v19 = vsub.f32 2.0, %v482_v9  ;;  %v2411_v39 = vld [vmem:[%s2951_s0 + $0x18] sm:$0xff]  ;;  %v2429_v9 = vld [vmem:[%s2951_s0 + $0x20] sm:$0xff]  ;;  %v2554_v23 = vld [vmem:[%s2951_s0 + $0x88] sm:$0xff] }
  0xa5   :  { %v515_v24 = vsub.f32 2.0, %v483_v22  ;;  %v516_v8 = vsub.f32 2.0, %v484_v54  ;;  %v517_v63 = vsub.f32 2.0, %v485_v2  ;;  %v518_v33 = vsub.f32 2.0, %v486_v15  ;;  %3296 = vst [vmem:[#allocation33_spill] sm:$0xff] %v2554_v23  ;;  %v2560_v47 = vld [vmem:[%s2951_s0 + $0x90] sm:$0xff] }
  0xa6   :  { %v519_v46 = vsub.f32 2.0, %v487_v26  ;;  %v520_v58 = vsub.f32 2.0, %v488_v35  ;;  %vm555_vm0 = vcmp.ge.f32.partialorder %v2387_v5, 0.0  ;;  %vm556_vm1 = vcmp.ge.f32.partialorder %v2393_v11, 0.0  ;;  %v2496_v35 = vld [vmem:[%s2951_s0 + $0x50] sm:$0xff]  ;;  %v2590_v23 = vld [vmem:[%s2951_s0 + $0xa8] sm:$0xff] }
  0xa7   :  { %v521_v1 = vsub.f32 2.0, %v489_v62  ;;  %v522_v41 = vsub.f32 2.0, %v490_v12  ;;  %v2397_v48 = vmul.f32 %v2226_v59, %v507_v61  ;;  %v2400_v32 = vmul.f32 %v2238_v37, %v508_v29  ;;  %v2502_v62 = vld [vmem:[%s2951_s0 + $0x58] sm:$0xff] }
  0xa8   :  { %vm557_vm2 = vcmp.ge.f32.partialorder %v2405_v56, 0.0  ;;  %vm558_vm3 = vcmp.ge.f32.partialorder %v2411_v39, 0.0  ;;  %v2415_v59 = vmul.f32 %v2247_v18, %v509_v57  ;;  %v2418_v37 = vmul.f32 %v2255_v53, %v510_v50  ;;  %v2622_v56 = vld [vmem:[%s2951_s0 + $0xc0] sm:$0xff]  ;;  %v1225_v39 = vld [vmem:[%s2951_s0 + $0xc8] sm:$0xff] }
  0xa9   :  { %3290 = vst [vmem:[#allocation59_spill] sm:$0xff] %v2397_v48  ;;  %v2421_v61 = vmul.f32 %v2262_v21, %v511_v51  ;;  %v2424_v40 = vmul.f32 %v2271_v49, %v512_v34  ;;  %vm559_vm4 = vcmp.ge.f32.partialorder %v2429_v9, 0.0  ;;  %v2433_v22 = vmul.f32 %v2280_v6, %v513_v52  ;;  %v2447_v49 = vld [vmem:[%s2951_s0 + $0x28] sm:$0xff]  ;;  %v2512_v51 = vld [vmem:[%s2951_s0 + $0x60] sm:$0xff]  ;;  %v3297_v9 = vld [vmem:[#allocation40_spill] sm:$0xff] }
  0xaa   :  { %3291 = vst [vmem:[#allocation31_spill] sm:$0xff] %v2400_v32  ;;  %v2436_v18 = vmul.f32 %v2288_v20, %v514_v19  ;;  %v2439_v53 = vmul.f32 %v2293_v27, %v515_v24  ;;  %v2442_v21 = vmul.f32 %v2296_v43, %v516_v8  ;;  %vm560_vm5 = vcmp.ge.f32.partialorder %v2447_v49, 0.0  ;;  %v2465_v43 = vld [vmem:[%s2951_s0 + $0x30] sm:$0xff]  ;;  %v2522_v8 = vld [vmem:[%s2951_s0 + $0x68] sm:$0xff]  ;;  %v2544_v24 = vld [vmem:[%s2951_s0 + $0x80] sm:$0xff] }
  0xab   :  { %v2451_v54 = vmul.f32 %v2299_v42, %v517_v63  ;;  %v2454_v6 = vmul.f32 %v2308_v55, %v518_v33  ;;  %v2457_v20 = vmul.f32 %v2319_v25, %v519_v46  ;;  %v2460_v27 = vmul.f32 %v2333_v14, %v520_v58  ;;  %v2476_v55 = vld [vmem:[%s2951_s0 + $0x38] sm:$0xff]  ;;  %v2482_v25 = vld [vmem:[%s2951_s0 + $0x40] sm:$0xff]  ;;  %v3293_v14 = vld [vmem:[#allocation55_spill] sm:$0xff]  ;;  %3295 = vst [vmem:[#allocation67_spill] sm:$0xff] %v2544_v24 }
  0xac   :  { %vm561_vm6 = vcmp.ge.f32.partialorder %v2465_v43, 0.0  ;;  %v2469_v2 = vmul.f32 %v2346_v17, %v521_v1  ;;  %v2471_v42 = vmul.f32 %v1131_v44, %v522_v41  ;;  %vm562_vm7 = vcmp.ge.f32.partialorder %v2476_v55, 0.0  ;;  %v3294_v17 = vld [vmem:[#allocation29_spill] sm:$0xff]  ;;  %v2490_v44 = vld [vmem:[%s2951_s0 + $0x48] sm:$0xff]  ;;  %v2528_v63 = vld [vmem:[%s2951_s0 + $0x70] sm:$0xff] }
  0xad   :  { %3292 = vst [vmem:[#allocation63_spill] sm:$0xff] %v2457_v20  ;;  %vm563_vm8 = vcmp.ge.f32.partialorder %v2482_v25, 0.0  ;;  %v587_v15 = vsub.f32 1.0, %v3293_v14  ;;  %v588_v26 = vsub.f32 1.0, %v3294_v17  ;;  %vm564_vm9 = vcmp.ge.f32.partialorder %v2490_v44, 0.0  ;;  %v2538_v41 = vld [vmem:[%s2951_s0 + $0x78] sm:$0xff] }
  0xae   :  { %vm565_vm10 = vcmp.ge.f32.partialorder %v2496_v35, 0.0  ;;  %vm566_vm11 = vcmp.ge.f32.partialorder %v2502_v62, 0.0  ;;  %v589_v12 = vsub.f32 1.0, %v2306_v10  ;;  %v590_v29 = vsub.f32 1.0, %v2311_v4  ;;  %v2570_v24 = vld [vmem:[%s2951_s0 + $0x98] sm:$0xff]  ;;  %v2584_v32 = vld [vmem:[%s2951_s0 + $0xa0] sm:$0xff] }
  0xaf   :  { %v591_v57 = vsub.f32 1.0, %v2314_v30  ;;  %v592_v50 = vsub.f32 1.0, %v2317_v3  ;;  %vm567_vm12 = vcmp.ge.f32.partialorder %v2512_v51, 0.0  ;;  %v593_v34 = vsub.f32 1.0, %v2322_v16  ;;  %v3300_v1 = vld [vmem:[#allocation45_spill] sm:$0xff]  ;;  %v1226_v25 = vld [vmem:[%s2951_s0 + $0xd0] sm:$0xff] }
  0xb0   :  { %vm568_vm13 = vcmp.ge.f32.partialorder %v2522_v8, 0.0  ;;  %v597_v33 = vsub.f32 1.0, %v2338_v28  ;;  %v598_v46 = vsub.f32 1.0, %v2341_v0  ;;  %v601_v19 = vsub.f32 1.0, %v2360_v60  ;;  %v3305_v55 = vld [vmem:[#allocation49_spill] sm:$0xff] }
  0xb1   :  { %v619_v58 = vsel %vm555_vm0, %v3293_v14, %v587_v15  ;;  %v620_v52 = vsel %vm556_vm1, %v3294_v17, %v588_v26  ;;  %vm575_vm14 = vcmp.ge.f32.partialorder %v2584_v32, 0.0  ;;  %vm576_vm15 = vcmp.ge.f32.partialorder %v2590_v23, 0.0  ;;  %v2604_v17 = vld [vmem:[%s2951_s0 + $0xb0] sm:$0xff] }
  0xb2   :  { %v621_v11 = vsel %vm557_vm2, %v2306_v10, %v589_v12  ;;  %v622_v15 = vsel %vm558_vm3, %v2311_v4, %v590_v29  ;;  %vm577_vm0 = vcmp.ge.f32.partialorder %v2604_v17, 0.0  ;;  %v623_v10 = vsel %vm559_vm4, %v2314_v30, %v591_v57  ;;  %v2616_v4 = vld [vmem:[%s2951_s0 + $0xb8] sm:$0xff]  ;;  %v3299_v26 = vld [vmem:[#allocation44_spill] sm:$0xff] }
  0xb3   :  { %vm578_vm1 = vcmp.ge.f32.partialorder %v2616_v4, 0.0  ;;  %vm579_vm2 = vcmp.ge.f32.partialorder %v2622_v56, 0.0  ;;  %v624_v30 = vsel %vm560_vm5, %v2317_v3, %v592_v50  ;;  %v651_v12 = vsub.f32 %v619_v58, %v3297_v9  ;;  %v3298_v29 = vld [vmem:[#allocation41_spill] sm:$0xff]  ;;  %v3317_v9 = vld [vmem:[#allocation31_spill] sm:$0xff] }
  0xb4   :  { %v652_v57 = vsub.f32 %v620_v52, %v3298_v29  ;;  %v617_v14 = vsub.f32 1.0, %v2469_v2  ;;  %v625_v5 = vsel %vm561_vm6, %v2322_v16, %v593_v34  ;;  %v653_v48 = vsub.f32 %v621_v11, %v3299_v26  ;;  %v3303_v34 = vld [vmem:[#allocation48_spill] sm:$0xff]  ;;  %v3319_v29 = vld [vmem:[#allocation33_spill] sm:$0xff] }
  0xb5   :  { %v654_v20 = vsub.f32 %v622_v15, %v3300_v1  ;;  %vm580_vm3 = vcmp.ge.f32.partialorder %v1225_v39, 0.0  ;;  %v618_v3 = vsub.f32 1.0, %v2471_v42  ;;  %v3301_v49 = vsub.f32 1.0, %v2325_v45  ;;  %v3334_v4 = vld [vmem:[#allocation61_spill] sm:$0xff] }
  0xb6   :  { %v3302_v43 = vsub.f32 1.0, %v2328_v31  ;;  %v655_v52 = vsub.f32 %v623_v10, %v3303_v34  ;;  %v3304_v58 = vsub.f32 1.0, %v2331_v36  ;;  %v2660_v11 = vsel %vm565_vm10, %v2338_v28, %v597_v33  ;;  %v3307_v28 = vld [vmem:[#allocation52_spill] sm:$0xff] }
  0xb7   :  { %v626_v50 = vsel %vm562_vm7, %v2325_v45, %v3301_v49  ;;  %v2665_v45 = vsel %vm566_vm11, %v2341_v0, %v598_v46  ;;  %vm581_vm4 = vcmp.ge.f32.partialorder %v1226_v25, 0.0  ;;  %v3306_v44 = vsub.f32 1.0, %v2344_v38  ;;  %v3323_v49 = vld [vmem:[#allocation56_spill] sm:$0xff]  ;;  %v3340_v25 = vld [vmem:[#allocation65_spill] sm:$0xff] }
  0xb8   :  { %v627_v16 = vsel %vm563_vm8, %v2328_v31, %v3302_v43  ;;  %v628_v1 = vsel %vm564_vm9, %v2331_v36, %v3304_v58  ;;  %v656_v31 = vsub.f32 %v624_v30, %v3305_v55  ;;  %v657_v35 = vsub.f32 %v625_v5, %v3307_v28  ;;  %v1228_v5 = vld [vmem:[%s2951_s0 + $0xe0] sm:$0xff] }
  0xb9   :  { %v2676_v36 = vsel %vm567_vm12, %v2344_v38, %v3306_v44  ;;  %v912_v33 = vadd.f32 -1.0, %v651_v12  ;;  %v913_v62 = vadd.f32 -1.0, %v652_v57  ;;  %v3308_v0 = vsub.f32 1.0, %v2351_v7  ;;  %v1227_v38 = vld [vmem:[%s2951_s0 + $0xd8] sm:$0xff] }
  0xba   :  { %vm3309_vm5 = vcmp.ge.f32.partialorder %v2528_v63, 0.0  ;;  %v914_v26 = vadd.f32 -1.0, %v653_v48  ;;  %v915_v51 = vadd.f32 -1.0, %v654_v20  ;;  %vm582_vm6 = vcmp.ge.f32.partialorder %v1227_v38, 0.0  ;;  %v3314_v20 = vld [vmem:[#allocation67_spill] sm:$0xff]  ;;  %v3316_v63 = vld [vmem:[#allocation53_spill] sm:$0xff] }
  0xbb   :  { %v2684_v46 = vsel %vm568_vm13, %v2351_v7, %v3308_v0  ;;  %v2689_v15 = vsel %vm3309_vm5, %v2360_v60, %v601_v19  ;;  %vm583_vm7 = vcmp.ge.f32.partialorder %v1228_v5, 0.0  ;;  %v3310_v7 = vsub.f32 1.0, %v2382_v13  ;;  %v3312_v60 = vld [vmem:[#allocation59_spill] sm:$0xff]  ;;  %v3342_v5 = vld [vmem:[#allocation68_spill] sm:$0xff] }
  0xbc   :  { %vm3311_vm8 = vcmp.ge.f32.partialorder %v2538_v41, 0.0  ;;  %v3313_v48 = vsub.f32 1.0, %v3312_v60  ;;  %vm3315_vm9 = vcmp.ge.f32.partialorder %v3314_v20, 0.0  ;;  %v658_v10 = vsub.f32 %v626_v50, %v3316_v63  ;;  %v1229_v50 = vld [vmem:[%s2951_s0 + $0xe8] sm:$0xff] }
  0xbd   :  { %v2702_v8 = vsel %vm3311_vm8, %v2382_v13, %v3310_v7  ;;  %v916_v30 = vadd.f32 -1.0, %v655_v52  ;;  %v3318_v12 = vsub.f32 1.0, %v3317_v9  ;;  %vm3320_vm10 = vcmp.ge.f32.partialorder %v3319_v29, 0.0  ;;  %v2733_v52 = vld [vmem:[%s2951_s0 + $0xf0] sm:$0xff] }
  0xbe   :  { %v2709_v19 = vsel %vm3315_vm9, %v3312_v60, %v3313_v48  ;;  %v3321_v13 = vsub.f32 1.0, %v2415_v59  ;;  %vm3322_vm11 = vcmp.ge.f32.partialorder %v2560_v47, 0.0  ;;  %v659_v43 = vsub.f32 %v627_v16, %v3323_v49  ;;  %v3332_v48 = vld [vmem:[#allocation60_spill] sm:$0xff] }
  0xbf   :  { %v2717_v57 = vsel %vm3320_vm10, %v3317_v9, %v3318_v12  ;;  %v917_v34 = vadd.f32 -1.0, %v656_v31  ;;  %vm584_vm12 = vcmp.ge.f32.partialorder %v1229_v50, 0.0  ;;  %vm585_vm13 = vcmp.ge.f32.partialorder %v2733_v52, 0.0  ;;  %v3343_v50 = vld [vmem:[#allocation69_spill] sm:$0xff] }
  0xc0   :  { %v2724_v41 = vsel %vm3322_vm11, %v2415_v59, %v3321_v13  ;;  %v3324_v58 = vsub.f32 1.0, %v2418_v37  ;;  %vm3325_vm5 = vcmp.ge.f32.partialorder %v2570_v24, 0.0  ;;  %v918_v59 = vadd.f32 -1.0, %v657_v35  ;;  %v2760_v35 = vld [vmem:[%s2951_s0 + $0xf8] sm:$0xff] }
  0xc1   :  { %v715_v16 = vmul.f32 19.96008, %v912_v33  ;;  %v716_v55 = vmul.f32 19.96008, %v913_v62  ;;  %v3326_v31 = vsub.f32 1.0, %v2421_v61  ;;  %v3327_v28 = vsub.f32 1.0, %v2424_v40 }
  0xc2   :  { %v2741_v47 = vsel %vm3325_vm5, %v2418_v37, %v3324_v58  ;;  %v717_v24 = vmul.f32 19.96008, %v914_v26  ;;  %v718_v37 = vmul.f32 19.96008, %v915_v51  ;;  %vm586_vm8 = vcmp.ge.f32.partialorder %v2760_v35, 0.0  ;;  %v3329_v33 = vld [vmem:[#allocation57_spill] sm:$0xff] }
  0xc3   :  { %v2748_v44 = vsel %vm575_vm14, %v2421_v61, %v3326_v31  ;;  %v2755_v0 = vsel %vm576_vm15, %v2424_v40, %v3327_v28  ;;  %v3328_v32 = vsub.f32 1.0, %v2433_v22  ;;  %v660_v23 = vsub.f32 %v628_v1, %v3329_v33 }
  0xc4   :  { %v919_v40 = vadd.f32 -1.0, %v658_v10  ;;  %v719_v62 = vmul.f32 19.96008, %v916_v30  ;;  %v3330_v26 = vsub.f32 1.0, %v2436_v18  ;;  %v3331_v7 = vsub.f32 1.0, %v2439_v53 }
  0xc5   :  { %v2768_v61 = vsel %vm577_vm0, %v2433_v22, %v3328_v32  ;;  %v920_v22 = vadd.f32 -1.0, %v659_v43  ;;  %v720_v17 = vmul.f32 19.96008, %v917_v34  ;;  %v661_v1 = vsub.f32 %v2660_v11, %v3332_v48  ;;  %v3336_v43 = vld [vmem:[#allocation64_spill] sm:$0xff] }
  0xc6   :  { %v2776_v51 = vsel %vm578_vm1, %v2436_v18, %v3330_v26  ;;  %v2783_v60 = vsel %vm579_vm2, %v2439_v53, %v3331_v7  ;;  %v721_v20 = vmul.f32 19.96008, %v918_v59  ;;  %v747_v63 = vmul.f32 1.442695, %v715_v16  ;;  %v3345_v7 = vld [vmem:[#allocation73_spill] sm:$0xff] }
  0xc7   :  { %v749_v10 = vmul.f32 1.442695, %v716_v55  ;;  %v3333_v30 = vsub.f32 1.0, %v2442_v21  ;;  %v662_v9 = vsub.f32 %v2665_v45, %v3334_v4  ;;  %v751_v56 = vmul.f32 1.442695, %v717_v24  ;;  %v3338_v55 = vld [vmem:[#allocation63_spill] sm:$0xff] }
  0xc8   :  { %v753_v53 = vmul.f32 1.442695, %v718_v37  ;;  %v921_v12 = vadd.f32 -1.0, %v660_v23  ;;  %v722_v29 = vmul.f32 19.96008, %v919_v40  ;;  %1132 = vpow2.f32 %v747_v63 }
  0xc9   :  { %v2791_v18 = vsel %vm580_vm3, %v2442_v21, %v3333_v30  ;;  %v755_v13 = vmul.f32 1.442695, %v719_v62  ;;  %v3335_v11 = vsub.f32 1.0, %v2451_v54  ;;  %v663_v39 = vsub.f32 %v2676_v36, %v3336_v43 }
  0xca   :  { %1134 = vpow2.f32 %v749_v10  ;;  %v757_v21 = vmul.f32 1.442695, %v720_v17  ;;  %v922_v34 = vadd.f32 -1.0, %v661_v1  ;;  %v723_v58 = vmul.f32 19.96008, %v920_v22 }
  0xcb   :  { %v2799_v49 = vsel %vm581_vm4, %v2451_v54, %v3335_v11  ;;  %1136 = vpow2.f32 %v751_v56  ;;  %v759_v45 = vmul.f32 1.442695, %v721_v20  ;;  %v3337_v59 = vsub.f32 1.0, %v2454_v6 }
  0xcc   :  { %v3339_v31 = vsub.f32 1.0, %v3338_v55  ;;  %v664_v36 = vsub.f32 %v2684_v46, %v3340_v25  ;;  %1138 = vpow2.f32 %v753_v53  ;;  %v923_v28 = vadd.f32 -1.0, %v662_v9 }
  0xcd   :  { %v2807_v16 = vsel %vm582_vm6, %v2454_v6, %v3337_v59  ;;  %v724_v24 = vmul.f32 19.96008, %v921_v12  ;;  %1140 = vpow2.f32 %v755_v13  ;;  %v761_v37 = vmul.f32 1.442695, %v722_v29  ;;  %v3346_v29 = vld [vmem:[#allocation82_spill] sm:$0xff] }
  0xce   :  { %v2813_v54 = vsel %vm583_vm7, %v3338_v55, %v3339_v31  ;;  %v3341_v32 = vsub.f32 1.0, %v2460_v27  ;;  %v2828_v38 = vsel %vm585_vm13, %v2469_v2, %v617_v14  ;;  %v665_v46 = vsub.f32 %v2689_v15, %v3342_v5  ;;  %v1133_v33 = vpop.eup %1132  ;;  %v3344_v14 = vld [vmem:[#allocation72_spill] sm:$0xff]  ;;  %v3347_v13 = vld [vmem:[#allocation6_spill] sm:$0xff]  ;;  %v3351_v5 = vld [vmem:[#allocation77_spill] sm:$0xff] }
  0xcf   :  { %1142 = vpow2.f32 %v757_v21  ;;  %v924_v23 = vadd.f32 -1.0, %v663_v39  ;;  %v725_v40 = vmul.f32 19.96008, %v922_v34  ;;  %v763_v62 = vmul.f32 1.442695, %v723_v58  ;;  %v3348_v34 = vld [vmem:[#allocation26_spill] sm:$0xff] }
  0xd0   :  { %v2821_v6 = vsel %vm584_vm12, %v2460_v27, %v3341_v32  ;;  %1144 = vpow2.f32 %v759_v45  ;;  %v1135_v26 = vpop.eup %1134  ;;  %v2837_v27 = vsel %vm586_vm8, %v2471_v42, %v618_v3  ;;  %v666_v2 = vsub.f32 %v2702_v8, %v3343_v50  ;;  %v3349_v45 = vld [vmem:[#allocation76_spill] sm:$0xff] }
  0xd1   :  { %v667_v15 = vsub.f32 %v2709_v19, %v3344_v14  ;;  %v668_v22 = vsub.f32 %v2717_v57, %v3345_v7  ;;  %v1137_v17 = vpop.eup %1136  ;;  %v925_v48 = vadd.f32 -1.0, %v664_v36  ;;  %v726_v1 = vmul.f32 19.96008, %v923_v28  ;;  %v3350_v31 = vld [vmem:[#allocation20_spill] sm:$0xff]  ;;  %v3353_v14 = vld [vmem:[#allocation78_spill] sm:$0xff] }
  0xd2   :  { %1146 = vpow2.f32 %v761_v37  ;;  %v765_v20 = vmul.f32 1.442695, %v724_v24  ;;  %v1139_v63 = vpop.eup %1138  ;;  %v926_v10 = vadd.f32 -1.0, %v665_v46  ;;  %v811_v30 = vsub.f32 1.0, %v1133_v33 }
  0xd3   :  { %v812_v4 = vsub.f32 1.0, %v1135_v26  ;;  %v813_v42 = vsub.f32 1.0, %v1137_v17  ;;  %v1141_v3 = vpop.eup %1140  ;;  %v727_v9 = vmul.f32 19.96008, %v924_v23  ;;  %1148 = vpow2.f32 %v763_v62  ;;  %v3352_v23 = vld [vmem:[#allocation86_spill] sm:$0xff] }
  0xd4   :  { %v767_v8 = vmul.f32 1.442695, %v725_v40  ;;  %v814_v56 = vsub.f32 1.0, %v1139_v63  ;;  %v927_v19 = vadd.f32 -1.0, %v666_v2  ;;  %v815_v12 = vsub.f32 1.0, %v1141_v3 }
  0xd5   :  { %v1143_v53 = vpop.eup %1142  ;;  %v843_v57 = vmul.f32 %v811_v30, %v3346_v29  ;;  %v844_v11 = vmul.f32 %v812_v4, %v3347_v13  ;;  %v728_v39 = vmul.f32 19.96008, %v925_v48  ;;  %1150 = vpow2.f32 %v765_v20  ;;  %v3355_v30 = vld [vmem:[#allocation80_spill] sm:$0xff] }
  0xd6   :  { %v1145_v43 = vpop.eup %1144  ;;  %v769_v21 = vmul.f32 1.442695, %v726_v1  ;;  %v845_v58 = vmul.f32 %v813_v42, %v3348_v34  ;;  %v669_v59 = vsub.f32 %v2724_v41, %v3349_v45  ;;  %v816_v55 = vsub.f32 1.0, %v1143_v53  ;;  %v3359_v34 = vld [vmem:[#allocation84_spill] sm:$0xff] }
  0xd7   :  { %v846_v25 = vmul.f32 %v814_v56, %v3350_v31  ;;  %v875_v36 = vadd.f32 %v844_v11, %v843_v57  ;;  %v928_v24 = vadd.f32 -1.0, %v667_v15  ;;  %v729_v37 = vmul.f32 19.96008, %v926_v10  ;;  %v3354_v15 = vld [vmem:[#allocation7_spill] sm:$0xff]  ;;  %v3358_v57 = vld [vmem:[#allocation30_spill] sm:$0xff] }
  0xd8   :  { %v1147_v28 = vpop.eup %1146  ;;  %1152 = vpow2.f32 %v767_v8  ;;  %v771_v32 = vmul.f32 1.442695, %v727_v9  ;;  %v670_v46 = vsub.f32 %v2741_v47, %v3351_v5  ;;  %v817_v33 = vsub.f32 1.0, %v1145_v43  ;;  %v3362_v5 = vld [vmem:[#allocation8_spill] sm:$0xff] }
  0xd9   :  { %v847_v40 = vmul.f32 %v815_v12, %v3352_v23  ;;  %v876_v62 = vadd.f32 %v875_v36, %v845_v58  ;;  %v1149_v26 = vpop.eup %1148  ;;  %v929_v50 = vadd.f32 -1.0, %v668_v22  ;;  %v730_v2 = vmul.f32 19.96008, %v927_v19  ;;  %v3356_v22 = vld [vmem:[#allocation28_spill] sm:$0xff]  ;;  %v3357_v19 = vld [vmem:[#allocation81_spill] sm:$0xff] }
  0xda   :  { %1154 = vpow2.f32 %v769_v21  ;;  %v773_v41 = vmul.f32 1.442695, %v728_v39  ;;  %v671_v7 = vsub.f32 %v2748_v44, %v3353_v14  ;;  %v818_v17 = vsub.f32 1.0, %v1147_v28 }
  0xdb   :  { %v848_v48 = vmul.f32 %v816_v55, %v3354_v15  ;;  %v877_v1 = vadd.f32 %v876_v62, %v846_v25  ;;  %v1151_v20 = vpop.eup %1150  ;;  %v930_v63 = vadd.f32 -1.0, %v669_v59  ;;  %v731_v10 = vmul.f32 19.96008, %v928_v24  ;;  %v3360_v59 = vld [vmem:[#allocation21_spill] sm:$0xff] }
  0xdc   :  { %1156 = vpow2.f32 %v771_v32  ;;  %v775_v47 = vmul.f32 1.442695, %v729_v37  ;;  %v672_v4 = vsub.f32 %v2755_v0, %v3355_v30  ;;  %v819_v42 = vsub.f32 1.0, %v1149_v26  ;;  %v3361_v24 = vld [vmem:[#allocation85_spill] sm:$0xff]  ;;  %v3363_v26 = vld [vmem:[#allocation88_spill] sm:$0xff] }
  0xdd   :  { %v849_v3 = vmul.f32 %v817_v33, %v3356_v22  ;;  %v878_v9 = vadd.f32 %v877_v1, %v847_v40  ;;  %v931_v56 = vadd.f32 -1.0, %v670_v46  ;;  %v732_v53 = vmul.f32 19.96008, %v929_v50  ;;  %v1232_v1 = vld [vmem:[%s2952_s1 + $0xd0] sm:$0xff] }
  0xde   :  { %v1153_v8 = vpop.eup %1152  ;;  %1158 = vpow2.f32 %v773_v41  ;;  %v777_v44 = vmul.f32 1.442695, %v730_v2  ;;  %v673_v12 = vsub.f32 %v2768_v61, %v3357_v19  ;;  %v820_v29 = vsub.f32 1.0, %v1151_v20  ;;  %v3364_v41 = vld [vmem:[#allocation9_spill] sm:$0xff] }
  0xdf   :  { %v850_v13 = vmul.f32 %v818_v17, %v3358_v57  ;;  %v879_v11 = vadd.f32 %v878_v9, %v848_v48  ;;  %v932_v39 = vadd.f32 -1.0, %v671_v7  ;;  %v733_v21 = vmul.f32 19.96008, %v930_v63  ;;  %v1234_v57 = vld [vmem:[%s2952_s1 + $0xe0] sm:$0xff] }
  0xe0   :  { %v1155_v43 = vpop.eup %1154  ;;  %1160 = vpow2.f32 %v775_v47  ;;  %v779_v0 = vmul.f32 1.442695, %v731_v10  ;;  %v674_v58 = vsub.f32 %v2776_v51, %v3359_v34  ;;  %v821_v45 = vsub.f32 1.0, %v1153_v8  ;;  %v3365_v10 = vld [vmem:[#allocation32_spill] sm:$0xff] }
  0xe1   :  { %v851_v55 = vmul.f32 %v819_v42, %v3360_v59  ;;  %v880_v31 = vadd.f32 %v879_v11, %v849_v3  ;;  %v933_v36 = vadd.f32 -1.0, %v672_v4  ;;  %v734_v28 = vmul.f32 19.96008, %v931_v56  ;;  %v1233_v3 = vld [vmem:[%s2952_s1 + $0xd8] sm:$0xff]  ;;  %v3366_v56 = vld [vmem:[#allocation22_spill] sm:$0xff]  ;;  %v1235_v59 = vld [vmem:[%s2952_s1 + $0xe8] sm:$0xff] }
  0xe2   :  { %v1157_v25 = vpop.eup %1156  ;;  %1162 = vpow2.f32 %v777_v44  ;;  %v781_v61 = vmul.f32 1.442695, %v732_v53  ;;  %v675_v37 = vsub.f32 %v2783_v60, %v3361_v24  ;;  %v822_v32 = vsub.f32 1.0, %v1155_v43  ;;  %v3367_v43 = vld [vmem:[#allocation34_spill] sm:$0xff] }
  0xe3   :  { %v852_v46 = vmul.f32 %v820_v29, %v3362_v5  ;;  %v881_v33 = vadd.f32 %v880_v31, %v850_v13  ;;  %v934_v40 = vadd.f32 -1.0, %v673_v12  ;;  %v735_v62 = vmul.f32 19.96008, %v932_v39  ;;  %v3368_v31 = vld [vmem:[#allocation10_spill] sm:$0xff] }
  0xe4   :  { %v1159_v23 = vpop.eup %1158  ;;  %1164 = vpow2.f32 %v779_v0  ;;  %v783_v51 = vmul.f32 1.442695, %v733_v21  ;;  %v676_v50 = vsub.f32 %v2791_v18, %v3363_v26  ;;  %v823_v2 = vsub.f32 1.0, %v1157_v25  ;;  %v2890_v0 = vld [vmem:[%s2952_s1 + $0xf0] sm:$0xff] }
  0xe5   :  { %v853_v14 = vmul.f32 %v821_v45, %v3364_v41  ;;  %v882_v7 = vadd.f32 %v881_v33, %v851_v55  ;;  %v935_v15 = vadd.f32 -1.0, %v674_v58  ;;  %v736_v48 = vmul.f32 19.96008, %v933_v36  ;;  %v3369_v33 = vld [vmem:[#allocation23_spill] sm:$0xff]  ;;  %v3370_v41 = vld [vmem:[#allocation37_spill] sm:$0xff] }
  0xe6   :  { %v1161_v17 = vpop.eup %1160  ;;  %1166 = vpow2.f32 %v781_v61  ;;  %v785_v60 = vmul.f32 1.442695, %v734_v28  ;;  %v677_v20 = vsub.f32 %v2799_v49, %v1232_v1  ;;  %v824_v63 = vsub.f32 1.0, %v1159_v23  ;;  %v2900_v61 = vld [vmem:[%s2952_s1 + $0xf8] sm:$0xff] }
  0xe7   :  { %v854_v47 = vmul.f32 %v822_v32, %v3365_v10  ;;  %v883_v30 = vadd.f32 %v882_v7, %v852_v46  ;;  %v936_v4 = vadd.f32 -1.0, %v675_v37  ;;  %v737_v42 = vmul.f32 19.96008, %v934_v40 }
  0xe8   :  { %v1163_v18 = vpop.eup %1162  ;;  %1168 = vpow2.f32 %v783_v51  ;;  %v787_v22 = vmul.f32 1.442695, %v735_v62  ;;  %v678_v9 = vsub.f32 %v2807_v16, %v1233_v3  ;;  %v825_v8 = vsub.f32 1.0, %v1161_v17 }
  0xe9   :  { %v855_v53 = vmul.f32 %v823_v2, %v3366_v56  ;;  %v884_v44 = vadd.f32 %v883_v30, %v853_v14  ;;  %v937_v19 = vadd.f32 -1.0, %v676_v50  ;;  %v738_v12 = vmul.f32 19.96008, %v935_v15 }
  0xea   :  { %v1165_v49 = vpop.eup %1164  ;;  %1170 = vpow2.f32 %v785_v60  ;;  %v789_v29 = vmul.f32 1.442695, %v736_v48  ;;  %v679_v13 = vsub.f32 %v2813_v54, %v1234_v57  ;;  %v826_v11 = vsub.f32 1.0, %v1163_v18  ;;  %v3371_v60 = vld [vmem:[#allocation90_spill] sm:$0xff]  ;;  %v3377_v57 = vld [vmem:[#allocation47_spill] sm:$0xff] }
  0xeb   :  { %v856_v39 = vmul.f32 %v824_v63, %v3367_v43  ;;  %v885_v21 = vadd.f32 %v884_v44, %v854_v47  ;;  %v938_v34 = vadd.f32 -1.0, %v677_v20  ;;  %v739_v58 = vmul.f32 19.96008, %v936_v4  ;;  %v3372_v20 = vld [vmem:[#allocation39_spill] sm:$0xff]  ;;  %v3373_v4 = vld [vmem:[#allocation74_spill] sm:$0xff] }
  0xec   :  { %v1167_v16 = vpop.eup %1166  ;;  %1172 = vpow2.f32 %v787_v22  ;;  %v791_v45 = vmul.f32 1.442695, %v737_v42  ;;  %v680_v54 = vsub.f32 %v2821_v6, %v1235_v59  ;;  %v827_v55 = vsub.f32 1.0, %v1165_v49  ;;  %v3374_v42 = vld [vmem:[#allocation43_spill] sm:$0xff]  ;;  %v3380_v59 = vld [vmem:[#allocation25_spill] sm:$0xff] }
  0xed   :  { %v857_v25 = vmul.f32 %v825_v8, %v3368_v31  ;;  %v886_v36 = vadd.f32 %v885_v21, %v855_v53  ;;  %v939_v24 = vadd.f32 -1.0, %v678_v9  ;;  %v740_v37 = vmul.f32 19.96008, %v937_v19  ;;  %v3375_v9 = vld [vmem:[#allocation24_spill] sm:$0xff]  ;;  %v3381_v31 = vld [vmem:[#allocation27_spill] sm:$0xff] }
  0xee   :  { %v1169_v28 = vpop.eup %1168  ;;  %1174 = vpow2.f32 %v789_v29  ;;  %v793_v32 = vmul.f32 1.442695, %v738_v12  ;;  %v681_v5 = vsub.f32 %v2828_v38, %v2890_v0  ;;  %v828_v46 = vsub.f32 1.0, %v1167_v16  ;;  %v3376_v12 = vld [vmem:[#allocation95_spill] sm:$0xff] }
  0xef   :  { %v858_v6 = vmul.f32 %v826_v11, %v3369_v33  ;;  %v887_v23 = vadd.f32 %v886_v36, %v856_v39  ;;  %v940_v62 = vadd.f32 -1.0, %v679_v13  ;;  %v741_v51 = vmul.f32 19.96008, %v938_v34  ;;  %v3378_v39 = vld [vmem:[#allocation96_spill] sm:$0xff]  ;;  %v3384_v33 = vld [vmem:[#allocation51_spill] sm:$0xff] }
  0xf0   :  { %v1171_v40 = vpop.eup %1170  ;;  %1176 = vpow2.f32 %v791_v45  ;;  %v795_v26 = vmul.f32 1.442695, %v739_v58  ;;  %v682_v50 = vsub.f32 %v2837_v27, %v2900_v61  ;;  %v829_v2 = vsub.f32 1.0, %v1169_v28  ;;  %v3379_v45 = vld [vmem:[#allocation4_spill] sm:$0xff] }
  0xf1   :  { %v859_v14 = vmul.f32 %v827_v55, %v3370_v41  ;;  %v888_v7 = vadd.f32 %v887_v23, %v857_v25  ;;  %v941_v15 = vadd.f32 -1.0, %v680_v54  ;;  %v742_v48 = vmul.f32 19.96008, %v939_v24  ;;  %v3382_v24 = vld [vmem:[#allocation97_spill] sm:$0xff] }
  0xf2   :  { %v1173_v17 = vpop.eup %1172  ;;  %1178 = vpow2.f32 %v793_v32  ;;  %v797_v38 = vmul.f32 1.442695, %v740_v37  ;;  %v830_v1 = vsub.f32 1.0, %v1171_v40  ;;  %v860_v63 = vmul.f32 %v828_v46, %v3372_v20  ;;  %v3383_v46 = vld [vmem:[#allocation18_spill] sm:$0xff] }
  0xf3   :  { %1180 = vlog2.f32 %v3371_v60  ;;  %v889_v10 = vadd.f32 %v888_v7, %v858_v6  ;;  %v942_v30 = vadd.f32 -1.0, %v681_v5  ;;  %v743_v18 = vmul.f32 19.96008, %v940_v62 }
  0xf4   :  { %v1175_v47 = vpop.eup %1174  ;;  %1182 = vpow2.f32 %v795_v26  ;;  %v799_v27 = vmul.f32 1.442695, %v741_v51  ;;  %v416_v22 = vadd.f32 %v3374_v42, %v3373_v4  ;;  %v831_v3 = vsub.f32 1.0, %v1173_v17  ;;  %v3385_v26 = vld [vmem:[#allocation91_spill] sm:$0xff] }
  0xf5   :  { %v861_v8 = vmul.f32 %v829_v2, %v3375_v9  ;;  %v890_v56 = vadd.f32 %v889_v10, %v859_v14  ;;  %v943_v44 = vadd.f32 -1.0, %v682_v50  ;;  %v744_v49 = vmul.f32 19.96008, %v941_v15  ;;  %v3386_v50 = vld [vmem:[#allocation11_spill] sm:$0xff]  ;;  %v3388_v14 = vld [vmem:[#allocation98_spill] sm:$0xff]  ;;  %v3390_v10 = vld [vmem:[#allocation92_spill] sm:$0xff] }
  0xf6   :  { %v1177_v53 = vpop.eup %1176  ;;  %1184 = vpow2.f32 %v797_v38  ;;  %v801_v19 = vmul.f32 1.442695, %v742_v48  ;;  %v832_v29 = vsub.f32 1.0, %v1175_v47  ;;  %v862_v13 = vmul.f32 %v830_v1, %v3377_v57  ;;  %v3389_v48 = vld [vmem:[#allocation5_spill] sm:$0xff]  ;;  %v3391_v47 = vld [vmem:[#allocation12_spill] sm:$0xff]  ;;  %v3398_v57 = vld [vmem:[#allocation3_spill] sm:$0xff] }
  0xf7   :  { %1186 = vlog2.f32 %v3376_v12  ;;  %v891_v11 = vadd.f32 %v890_v56, %v860_v63  ;;  %v380_v21 = vmul.f32 0.6931472, %v3378_v39  ;;  %v745_v16 = vmul.f32 19.96008, %v942_v30 }
  0xf8   :  { %v1179_v43 = vpop.eup %1178  ;;  %1188 = vpow2.f32 %v799_v27  ;;  %v803_v34 = vmul.f32 1.442695, %v743_v18  ;;  %v417_v54 = vadd.f32 %v3380_v59, %v3379_v45  ;;  %v833_v55 = vsub.f32 1.0, %v1177_v53  ;;  %v3393_v27 = vld [vmem:[#allocation2_spill] sm:$0xff] }
  0xf9   :  { %v1181_v58 = vpop.eup %1180  ;;  %v863_v25 = vmul.f32 %v831_v3, %v3381_v31  ;;  %v892_v36 = vadd.f32 %v891_v11, %v861_v8  ;;  %v382_v37 = vmul.f32 0.6931472, %v3382_v24  ;;  %v746_v32 = vmul.f32 19.96008, %v943_v44  ;;  %v3399_v45 = vld [vmem:[#allocation94_spill] sm:$0xff] }
  0xfa   :  { %v1183_v28 = vpop.eup %1182  ;;  %1190 = vpow2.f32 %v801_v19  ;;  %v805_v5 = vmul.f32 1.442695, %v744_v49  ;;  %v418_v6 = vadd.f32 %v3384_v33, %v3383_v46  ;;  %v834_v23 = vsub.f32 1.0, %v1179_v43  ;;  %v3395_v49 = vld [vmem:[#allocation93_spill] sm:$0xff]  ;;  %v3400_v59 = vld [vmem:[#allocation14_spill] sm:$0xff] }
  0xfb   :  { %v864_v40 = vmul.f32 %v832_v29, %v416_v22  ;;  %v893_v62 = vadd.f32 %v892_v36, %v862_v13  ;;  %v3387_v2 = vmax.f32 %v3386_v50, 0.0  ;;  %v384_v7 = vmul.f32 0.6931472, %v3388_v14  ;;  %v3394_v22 = vld [vmem:[#allocation19_spill] sm:$0xff]  ;;  %v3396_v19 = vld [vmem:[#allocation13_spill] sm:$0xff] }
  0xfc   :  { %v1185_v51 = vpop.eup %1184  ;;  %1192 = vpow2.f32 %v803_v34  ;;  %v807_v17 = vmul.f32 1.442695, %v745_v16  ;;  %v419_v38 = vadd.f32 %v380_v21, %v3389_v48  ;;  %v835_v60 = vsub.f32 1.0, %v1183_v28 }
  0xfd   :  { %v325_v41 = vsub.f32 %v3387_v2, %v3385_v26  ;;  %v1187_v15 = vpop.eup %1186  ;;  %v865_v1 = vmul.f32 %v833_v55, %v417_v54  ;;  %v894_v20 = vadd.f32 %v893_v62, %v863_v25  ;;  %v3392_v30 = vmax.f32 %v3391_v47, 0.0 }
  0xfe   :  { %v1189_v63 = vpop.eup %1188  ;;  %v386_v4 = vmul.f32 0.6931472, %v3393_v27  ;;  %1194 = vpow2.f32 %v805_v5  ;;  %v809_v42 = vmul.f32 1.442695, %v746_v32  ;;  %v420_v3 = vadd.f32 %v382_v37, %v3394_v22  ;;  %v3403_v37 = vld [vmem:[#allocation15_spill] sm:$0xff] }
  0xff   :  { %v326_v18 = vsub.f32 %v3392_v30, %v3390_v10  ;;  %v836_v9 = vsub.f32 1.0, %v1185_v51  ;;  %v866_v8 = vmul.f32 %v834_v23, %v418_v6  ;;  %v895_v56 = vadd.f32 %v894_v20, %v864_v40  ;;  %v3405_v40 = vld [vmem:[#allocation16_spill] sm:$0xff] }
 0x100   :  { %v1191_v53 = vpop.eup %1190  ;;  %v297_v44 = vmul.f32 %v2733_v52, %v2890_v0  ;;  %v3397_v12 = vmax.f32 %v3396_v19, 0.0  ;;  %v388_v13 = vmul.f32 0.6931472, %v3398_v57  ;;  %1196 = vpow2.f32 %v807_v17  ;;  %v3402_v52 = vld [vmem:[#allocation17_spill] sm:$0xff] }
 0x101   :  { %v421_v11 = vadd.f32 %v384_v7, %v325_v41  ;;  %v837_v43 = vsub.f32 1.0, %v1189_v63  ;;  %v867_v39 = vmul.f32 %v835_v60, %v419_v38  ;;  %v896_v21 = vadd.f32 %v895_v56, %v865_v1 }
 0x102   :  { %v327_v29 = vsub.f32 %v3397_v12, %v3395_v49  ;;  %v1193_v16 = vpop.eup %1192  ;;  %v298_v34 = vmul.f32 %v2760_v35, %v2900_v61  ;;  %v3401_v54 = vmax.f32 %v3400_v59, 0.0  ;;  %v390_v0 = vmul.f32 0.6931472, %v3402_v52 }
 0x103   :  { %1198 = vpow2.f32 %v809_v42  ;;  %v422_v31 = vadd.f32 %v386_v4, %v326_v18  ;;  %v838_v25 = vsub.f32 1.0, %v1191_v53  ;;  %v868_v36 = vmul.f32 %v836_v9, %v420_v3 }
 0x104   :  { %v328_v55 = vsub.f32 %v3401_v54, %v3399_v45  ;;  %v897_v28 = vadd.f32 %v896_v21, %v866_v8  ;;  %v1195_v24 = vpop.eup %1194  ;;  %v3404_v32 = vmax.f32 %v3403_v37, 0.0  ;;  %v392_v46 = vmul.f32 0.6931472, %v1181_v58 }
 0x105   :  { %v423_v33 = vadd.f32 %v388_v13, %v327_v29  ;;  %v839_v6 = vsub.f32 1.0, %v1193_v16  ;;  %v869_v23 = vmul.f32 %v837_v43, %v421_v11  ;;  %v3406_v62 = vmax.f32 %v3405_v40, 0.0 }
 0x106   :  { %v329_v5 = vsub.f32 %v3404_v32, %v297_v44  ;;  %v898_v35 = vadd.f32 %v897_v28, %v867_v39  ;;  %v1197_v61 = vpop.eup %1196  ;;  %v394_v26 = vmul.f32 0.6931472, %v1187_v15  ;;  %v424_v50 = vadd.f32 %v390_v0, %v328_v55 }
 0x107   :  { %v330_v51 = vsub.f32 %v3406_v62, %v298_v34  ;;  %v840_v2 = vsub.f32 1.0, %v1195_v24  ;;  %v870_v41 = vmul.f32 %v838_v25, %v422_v31  ;;  %v841_v48 = vsub.f32 1.0, %v1197_v61 }
 0x108   :  { %v899_v14 = vadd.f32 %v898_v35, %v868_v36  ;;  %v425_v17 = vadd.f32 %v392_v46, %v329_v5  ;;  %v871_v38 = vmul.f32 %v839_v6, %v423_v33 }
 0x109   :  { %v1199_v7 = vpop.eup %1198  ;;  %v426_v1 = vadd.f32 %v394_v26, %v330_v51  ;;  %v872_v20 = vmul.f32 %v840_v2, %v424_v50 }
 0x10a   :  { %v900_v60 = vadd.f32 %v899_v14, %v869_v23  ;;  %v842_v58 = vsub.f32 1.0, %v1199_v7  ;;  %v873_v10 = vmul.f32 %v841_v48, %v425_v17 }
 0x10c   :  { %v901_v63 = vadd.f32 %v900_v60, %v870_v41  ;;  %v874_v30 = vmul.f32 %v842_v58, %v426_v1 }
 0x10e   :  { %v902_v47 = vadd.f32 %v901_v63, %v871_v38 }
 0x110   :  { %v903_v18 = vadd.f32 %v902_v47, %v872_v20 }
 0x112   :  { %v904_v27 = vadd.f32 %v903_v18, %v873_v10 }
 0x114   :  { %v905_v4 = vadd.f32 %v904_v27, %v874_v30 }
 0x116   :  { %907 = vst [vmem:[%s2953_s2] sm:$0xff] %v905_v4 }

</bundles_post_ra>
